<compile_context>
chip_gen: v7x
topology: tpu7x:2x2x1
jax: 0.10.0
libtpu: 0.0.40
codegen_flags: <defaults>
</compile_context>

<pallas_src>
import numpy as np

import jax
import jax.numpy as jnp
from jax.experimental import pallas as pl
from jax.experimental.pallas import tpu as pltpu


# ----------------------------------------------------------------------------
# Model configuration (mimics heads loaded from JSON / checkpoints)
# ----------------------------------------------------------------------------
CFG = dict(
    in_ch=4,
    img=16,
    patch=8,
    dim=32,
    n_heads=4,
    mlp=64,
    layers=2,
    # name -> (num_classes, idx, thresh)
    diagnosis_heads={
        "tumor": (2, 1, 0.30),
        "stroke": (3, 2, 0.10),
        "ms": (2, 1, 0.50),
    },
    referral_heads={
        "urgent_referral": (2, 1, 0.25),
        "routine_referral": (2, 0, 0.40),
    },
    n_priority=4,
)

_OUT_COLS = 128  # lane-dense output slab width


# ----------------------------------------------------------------------------
# The single fused Pallas kernel
# ----------------------------------------------------------------------------
def _make_fused_kernel(B, N, D, H, L, eps, out_cols, n_logits):
    dh = D // H
    scale = 1.0 / float(dh) ** 0.5
    pad = out_cols - D - n_logits
    assert pad >= 0

    def _layernorm(x, g, b):
        mean = jnp.mean(x, axis=-1, keepdims=True)
        var = jnp.mean(jnp.square(x - mean), axis=-1, keepdims=True)
        return (x - mean) * jax.lax.rsqrt(var + eps) * g + b

    def kernel(*refs):
        out_ref = refs[-1]
        it = iter(refs[:-1])
        nxt = lambda: next(it)[...]

        patches = nxt()            # (B*N, C*P*P)
        pool = nxt()               # (B, B*N) constant pooling matrix
        patch_w = nxt()            # (C*P*P, D)
        patch_b = nxt()            # (1, D)
        pos = nxt()                # (N, D)

        # patch embedding + positional embedding (pos tiled per batch)
        tok = jnp.dot(patches, patch_w, preferred_element_type=jnp.float32) + patch_b
        tok = tok + jnp.concatenate([pos] * B, axis=0)           # (B*N, D)

        for _ in range(L):
            ln1_g, ln1_b = nxt(), nxt()
            w_qkv, b_qkv = nxt(), nxt()
            w_o, b_o = nxt(), nxt()
            ln2_g, ln2_b = nxt(), nxt()
            w_fc1, b_fc1 = nxt(), nxt()
            w_fc2, b_fc2 = nxt(), nxt()

            # ---- multi-head self-attention ----
            h = _layernorm(tok, ln1_g, ln1_b)
            qkv = jnp.dot(h, w_qkv, preferred_element_type=jnp.float32) + b_qkv
            q = qkv[:, 0:D]
            k = qkv[:, D:2 * D]
            v = qkv[:, 2 * D:3 * D]

            # Heads handled with static row/column slices; Python loops fully
            # unroll at trace time.  No 5-D transposes, no HBM round-trips.
            batch_blocks = []
            for b in range(B):
                r0 = b * N
                head_blocks = []
                for hh in range(H):
                    c0 = hh * dh
                    qh = q[r0:r0 + N, c0:c0 + dh]
                    kh = k[r0:r0 + N, c0:c0 + dh]
                    vh = v[r0:r0 + N, c0:c0 + dh]
                    s = jnp.einsum("qd,kd->qk", qh, kh,
                                   preferred_element_type=jnp.float32) * scale
                    m = jnp.max(s, axis=-1, keepdims=True)
                    p = jnp.exp(s - m)
                    l = jnp.sum(p, axis=-1, keepdims=True)
                    o = jnp.dot(p, vh, preferred_element_type=jnp.float32)
                    head_blocks.append(o * pl.reciprocal(l, approx=True))
                batch_blocks.append(jnp.concatenate(head_blocks, axis=1))
            attn = jnp.concatenate(batch_blocks, axis=0)          # (B*N, D)

            tok = tok + jnp.dot(attn, w_o, preferred_element_type=jnp.float32) + b_o

            # ---- MLP ----
            h = _layernorm(tok, ln2_g, ln2_b)
            h = jnp.dot(h, w_fc1, preferred_element_type=jnp.float32) + b_fc1
            # TODO(synk): reference CLIP may use QuickGELU (x*sigmoid(1.702x))
            # or exact-erf GELU; tanh-approximate GELU is used here.
            h = jax.nn.gelu(h, approximate=True)
            tok = tok + jnp.dot(h, w_fc2, preferred_element_type=jnp.float32) + b_fc2

        lnf_g, lnf_b = nxt(), nxt()
        proj_w, proj_b = nxt(), nxt()
        heads_w, heads_b = nxt(), nxt()

        # final LN + mean-pool over tokens (as a matmul) + visual projection
        # TODO(synk): assumes retpool = mean over patch tokens; a CLS-token
        # pooled CLIP variant would differ.
        tok = _layernorm(tok, lnf_g, lnf_b)
        pooled = jnp.dot(pool, tok, preferred_element_type=jnp.float32)       # (B, D)
        embed = jnp.dot(pooled, proj_w, preferred_element_type=jnp.float32) + proj_b
        logits = jnp.dot(embed, heads_w, preferred_element_type=jnp.float32) + heads_b

        # single lane-dense (B, 128) store: [embed | logits | zero pad]
        slab = jnp.concatenate(
            [embed, logits, jnp.zeros((B, pad), jnp.float32)], axis=1)
        out_ref[...] = slab

    return kernel


# ----------------------------------------------------------------------------
# Parameter init (deterministic, stands in for the torch checkpoints/JSON)
# ----------------------------------------------------------------------------
def _dense(key, fan_in, fan_out, std=0.02):
    kw, kb = jax.random.split(key)
    w = jax.random.normal(kw, (fan_in, fan_out), jnp.float32) * std
    b = jax.random.normal(kb, (1, fan_out), jnp.float32) * 0.01   # 2-D bias
    return w, b


def init_params(key, cfg=CFG):
    D = cfg["dim"]
    patch_dim = cfg["in_ch"] * cfg["patch"] * cfg["patch"]
    n_tokens = (cfg["img"] // cfg["patch"]) ** 2
    keys = jax.random.split(key, 16)
    p = {}
    p["patch_w"], p["patch_b"] = _dense(keys[0], patch_dim, D)
    p["pos"] = jax.random.normal(keys[1], (n_tokens, D), jnp.float32) * 0.02
    layers = []
    for li in range(cfg["layers"]):
        lk = jax.random.split(keys[2 + li], 8)
        lp = {}
        lp["ln1_g"] = jnp.ones((1, D), jnp.float32)
        lp["ln1_b"] = jnp.zeros((1, D), jnp.float32)
        lp["w_qkv"], lp["b_qkv"] = _dense(lk[0], D, 3 * D)
        lp["w_o"], lp["b_o"] = _dense(lk[1], D, D)
        lp["ln2_g"] = jnp.ones((1, D), jnp.float32)
        lp["ln2_b"] = jnp.zeros((1, D), jnp.float32)
        lp["w_fc1"], lp["b_fc1"] = _dense(lk[2], D, cfg["mlp"])
        lp["w_fc2"], lp["b_fc2"] = _dense(lk[3], cfg["mlp"], D)
        layers.append(lp)
    p["layers"] = layers
    p["lnf_g"] = jnp.ones((1, D), jnp.float32)
    p["lnf_b"] = jnp.zeros((1, D), jnp.float32)
    p["proj_w"], p["proj_b"] = _dense(keys[10], D, D)

    # classification heads packed into one weight matrix (columns)
    head_specs = []  # (group, name, start, ncls, idx, thresh)
    w_cols, b_cols = [], []
    col = 0
    hk = jax.random.split(keys[11], 8)
    hki = 0
    for group, heads in (("diagnosis", cfg["diagnosis_heads"]),
                         ("referral", cfg["referral_heads"])):
        for name, (ncls, idx, thresh) in heads.items():
            w, b = _dense(hk[hki], D, ncls)
            hki += 1
            w_cols.append(w)
            b_cols.append(b)
            head_specs.append((group, name, col, ncls, idx, float(thresh)))
            col += ncls
    w, b = _dense(keys[12], D, cfg["n_priority"])
    w_cols.append(w)
    b_cols.append(b)
    head_specs.append(("priority", "priority", col, cfg["n_priority"], -1, 0.0))
    col += cfg["n_priority"]
    p["heads_w"] = jnp.concatenate(w_cols, axis=1)   # (D, total_cols)
    p["heads_b"] = jnp.concatenate(b_cols, axis=1)   # (1, total_cols)
    p["head_specs"] = head_specs
    return p


def _flatten_params(p):
    flat = [p["patch_w"], p["patch_b"], p["pos"]]
    for lp in p["layers"]:
        flat += [lp["ln1_g"], lp["ln1_b"], lp["w_qkv"], lp["b_qkv"],
                 lp["w_o"], lp["b_o"], lp["ln2_g"], lp["ln2_b"],
                 lp["w_fc1"], lp["b_fc1"], lp["w_fc2"], lp["b_fc2"]]
    flat += [p["lnf_g"], p["lnf_b"], p["proj_w"], p["proj_b"],
             p["heads_w"], p["heads_b"]]
    return tuple(flat)


# ----------------------------------------------------------------------------
# Forward pass (mirrors FullMRIModel.forward)
# ----------------------------------------------------------------------------
def _patchify(x, patch):
    # (B, C, H, W) -> (B*N, C*P*P), same ordering as a stride-P Conv2d patch embed
    B, C, Himg, Wimg = x.shape
    P = patch
    x = x.reshape(B, C, Himg // P, P, Wimg // P, P)
    x = jnp.transpose(x, (0, 2, 4, 1, 3, 5))            # (B, Hp, Wp, C, P, P)
    return x.reshape(B * (Himg // P) * (Wimg // P), C * P * P)


@jax.jit
def _encode(x, flat_params):
    """Patchify + single fused Pallas kernel -> (clip_embed, head_logits)."""
    B = x.shape[0]
    P, D, H, L = CFG["patch"], CFG["dim"], CFG["n_heads"], CFG["layers"]
    N = (x.shape[2] // P) * (x.shape[3] // P)

    patches = _patchify(x, P)                            # (B*N, C*P*P)
    # constant token-mean-pooling matrix (compile-time constant)
    pool = jnp.asarray(np.kron(np.eye(B), np.full((1, N), 1.0 / N)), jnp.float32)

    n_logits = flat_params[-2].shape[1]
    kernel = _make_fused_kernel(B, N, D, H, L, 1e-5, _OUT_COLS, n_logits)
    n_in = 2 + len(flat_params)

    slab = pl.pallas_call(
        kernel,
        in_specs=[pl.BlockSpec(memory_space=pltpu.MemorySpace.VMEM)] * n_in,
        out_specs=pl.BlockSpec(memory_space=pltpu.MemorySpace.VMEM),
        out_shape=jax.ShapeDtypeStruct((B, _OUT_COLS), jnp.float32),
    )(patches, pool, *flat_params)

    return slab[:, :D], slab[:, D:D + n_logits]


def full_mri_model_forward(params, x, cfg=CFG):
    clip_embed, logits = _encode(x, _flatten_params(params))
    retdict = {"diagnosis": {}, "referral": {}, "priority": {}, "clip_emb": clip_embed}
    for group, name, start, ncls, idx, thresh in params["head_specs"]:
        if group == "priority":
            for i, level in enumerate(["none", "low", "medium", "high"]):
                retdict["priority"][level] = logits[:, start + i]
        else:
            retdict[group][name] = logits[:, start + idx] - thresh
    return retdict


# ----------------------------------------------------------------------------
if __name__ == "__main__":
    key = jax.random.PRNGKey(0)
    pkey, xkey = jax.random.split(key)
    params = init_params(pkey)
    x = jax.random.normal(xkey, (2, CFG["in_ch"], CFG["img"], CFG["img"]), jnp.float32)

    out = full_mri_model_forward(params, x)
    out = jax.block_until_ready(out)

    # light sanity checks on shapes
    assert out["clip_emb"].shape == (2, CFG["dim"])
    assert all(v.shape == (2,) for v in out["diagnosis"].values())
    assert all(v.shape == (2,) for v in out["referral"].values())
    assert all(v.shape == (2,) for v in out["priority"].values())
    print("KERNEL_OK")
</pallas_src>

<mosaic_0001>
module attributes {stable_mosaic.version = 11 : i64} {
  func.func @kernel(%arg0: memref<8x256xf32, #tpu.memory_space<vmem>>, %arg1: memref<2x8xf32, #tpu.memory_space<vmem>>, %arg2: memref<256x32xf32, #tpu.memory_space<vmem>>, %arg3: memref<1x32xf32, #tpu.memory_space<vmem>>, %arg4: memref<4x32xf32, #tpu.memory_space<vmem>>, %arg5: memref<1x32xf32, #tpu.memory_space<vmem>>, %arg6: memref<1x32xf32, #tpu.memory_space<vmem>>, %arg7: memref<32x96xf32, #tpu.memory_space<vmem>>, %arg8: memref<1x96xf32, #tpu.memory_space<vmem>>, %arg9: memref<32x32xf32, #tpu.memory_space<vmem>>, %arg10: memref<1x32xf32, #tpu.memory_space<vmem>>, %arg11: memref<1x32xf32, #tpu.memory_space<vmem>>, %arg12: memref<1x32xf32, #tpu.memory_space<vmem>>, %arg13: memref<32x64xf32, #tpu.memory_space<vmem>>, %arg14: memref<1x64xf32, #tpu.memory_space<vmem>>, %arg15: memref<64x32xf32, #tpu.memory_space<vmem>>, %arg16: memref<1x32xf32, #tpu.memory_space<vmem>>, %arg17: memref<1x32xf32, #tpu.memory_space<vmem>>, %arg18: memref<1x32xf32, #tpu.memory_space<vmem>>, %arg19: memref<32x96xf32, #tpu.memory_space<vmem>>, %arg20: memref<1x96xf32, #tpu.memory_space<vmem>>, %arg21: memref<32x32xf32, #tpu.memory_space<vmem>>, %arg22: memref<1x32xf32, #tpu.memory_space<vmem>>, %arg23: memref<1x32xf32, #tpu.memory_space<vmem>>, %arg24: memref<1x32xf32, #tpu.memory_space<vmem>>, %arg25: memref<32x64xf32, #tpu.memory_space<vmem>>, %arg26: memref<1x64xf32, #tpu.memory_space<vmem>>, %arg27: memref<64x32xf32, #tpu.memory_space<vmem>>, %arg28: memref<1x32xf32, #tpu.memory_space<vmem>>, %arg29: memref<1x32xf32, #tpu.memory_space<vmem>>, %arg30: memref<1x32xf32, #tpu.memory_space<vmem>>, %arg31: memref<32x32xf32, #tpu.memory_space<vmem>>, %arg32: memref<1x32xf32, #tpu.memory_space<vmem>>, %arg33: memref<32x15xf32, #tpu.memory_space<vmem>>, %arg34: memref<1x15xf32, #tpu.memory_space<vmem>>, %arg35: memref<2x128xf32, #tpu.memory_space<vmem>>) attributes {dimension_semantics = [], scalar_prefetch = 0 : i64, scratch_operands = 0 : i64, tpu.core_type = #tpu.core_type<tc>} {
    %c0 = arith.constant 0 : index
    %c0_0 = arith.constant 0 : index
    %0 = vector.load %arg0[%c0, %c0_0] : memref<8x256xf32, #tpu.memory_space<vmem>>, vector<8x256xf32>
    %c0_1 = arith.constant 0 : index
    %c0_2 = arith.constant 0 : index
    %1 = vector.load %arg1[%c0_1, %c0_2] : memref<2x8xf32, #tpu.memory_space<vmem>>, vector<2x8xf32>
    %c0_3 = arith.constant 0 : index
    %c0_4 = arith.constant 0 : index
    %2 = vector.load %arg2[%c0_3, %c0_4] : memref<256x32xf32, #tpu.memory_space<vmem>>, vector<256x32xf32>
    %c0_5 = arith.constant 0 : index
    %c0_6 = arith.constant 0 : index
    %3 = vector.load %arg3[%c0_5, %c0_6] : memref<1x32xf32, #tpu.memory_space<vmem>>, vector<1x32xf32>
    %c0_7 = arith.constant 0 : index
    %c0_8 = arith.constant 0 : index
    %4 = vector.load %arg4[%c0_7, %c0_8] : memref<4x32xf32, #tpu.memory_space<vmem>>, vector<4x32xf32>
    %cst = arith.constant dense<0.000000e+00> : vector<8x32xf32>
    %5 = tpu.matmul %0, %2, %cst {dimension_numbers = #tpu.dot_dimension_numbers<[1], [0], [0], [1], [0, 0, 1, 1], [], []>} : vector<8x256xf32>, vector<256x32xf32>, vector<8x32xf32> -> vector<8x32xf32>
    %6 = vector.broadcast %3 : vector<1x32xf32> to vector<8x32xf32>
    %7 = arith.addf %5, %6 : vector<8x32xf32>
    %8 = tpu.concatenate %4, %4 in 0 : vector<4x32xf32>, vector<4x32xf32> -> vector<8x32xf32>
    %9 = arith.addf %7, %8 : vector<8x32xf32>
    %c0_9 = arith.constant 0 : index
    %c0_10 = arith.constant 0 : index
    %10 = vector.load %arg5[%c0_9, %c0_10] : memref<1x32xf32, #tpu.memory_space<vmem>>, vector<1x32xf32>
    %c0_11 = arith.constant 0 : index
    %c0_12 = arith.constant 0 : index
    %11 = vector.load %arg6[%c0_11, %c0_12] : memref<1x32xf32, #tpu.memory_space<vmem>>, vector<1x32xf32>
    %c0_13 = arith.constant 0 : index
    %c0_14 = arith.constant 0 : index
    %12 = vector.load %arg7[%c0_13, %c0_14] : memref<32x96xf32, #tpu.memory_space<vmem>>, vector<32x96xf32>
    %c0_15 = arith.constant 0 : index
    %c0_16 = arith.constant 0 : index
    %13 = vector.load %arg8[%c0_15, %c0_16] : memref<1x96xf32, #tpu.memory_space<vmem>>, vector<1x96xf32>
    %c0_17 = arith.constant 0 : index
    %c0_18 = arith.constant 0 : index
    %14 = vector.load %arg9[%c0_17, %c0_18] : memref<32x32xf32, #tpu.memory_space<vmem>>, vector<32x32xf32>
    %c0_19 = arith.constant 0 : index
    %c0_20 = arith.constant 0 : index
    %15 = vector.load %arg10[%c0_19, %c0_20] : memref<1x32xf32, #tpu.memory_space<vmem>>, vector<1x32xf32>
    %c0_21 = arith.constant 0 : index
    %c0_22 = arith.constant 0 : index
    %16 = vector.load %arg11[%c0_21, %c0_22] : memref<1x32xf32, #tpu.memory_space<vmem>>, vector<1x32xf32>
    %c0_23 = arith.constant 0 : index
    %c0_24 = arith.constant 0 : index
    %17 = vector.load %arg12[%c0_23, %c0_24] : memref<1x32xf32, #tpu.memory_space<vmem>>, vector<1x32xf32>
    %c0_25 = arith.constant 0 : index
    %c0_26 = arith.constant 0 : index
    %18 = vector.load %arg13[%c0_25, %c0_26] : memref<32x64xf32, #tpu.memory_space<vmem>>, vector<32x64xf32>
    %c0_27 = arith.constant 0 : index
    %c0_28 = arith.constant 0 : index
    %19 = vector.load %arg14[%c0_27, %c0_28] : memref<1x64xf32, #tpu.memory_space<vmem>>, vector<1x64xf32>
    %c0_29 = arith.constant 0 : index
    %c0_30 = arith.constant 0 : index
    %20 = vector.load %arg15[%c0_29, %c0_30] : memref<64x32xf32, #tpu.memory_space<vmem>>, vector<64x32xf32>
    %c0_31 = arith.constant 0 : index
    %c0_32 = arith.constant 0 : index
    %21 = vector.load %arg16[%c0_31, %c0_32] : memref<1x32xf32, #tpu.memory_space<vmem>>, vector<1x32xf32>
    %cst_33 = arith.constant dense<0.000000e+00> : vector<8xf32>
    %22 = vector.multi_reduction <add>, %9, %cst_33 [1] : vector<8x32xf32> to vector<8xf32>
    %23 = vector.shape_cast %22 : vector<8xf32> to vector<8x1xf32>
    %cst_34 = arith.constant 3.200000e+01 : f32
    %24 = vector.broadcast %cst_34 : f32 to vector<8x1xf32>
    %25 = arith.divf %23, %24 : vector<8x1xf32>
    %26 = vector.broadcast %25 : vector<8x1xf32> to vector<8x32xf32>
    %27 = arith.subf %9, %26 : vector<8x32xf32>
    %28 = arith.mulf %27, %27 : vector<8x32xf32>
    %cst_35 = arith.constant dense<0.000000e+00> : vector<8xf32>
    %29 = vector.multi_reduction <add>, %28, %cst_35 [1] : vector<8x32xf32> to vector<8xf32>
    %30 = vector.shape_cast %29 : vector<8xf32> to vector<8x1xf32>
    %cst_36 = arith.constant 3.200000e+01 : f32
    %31 = vector.broadcast %cst_36 : f32 to vector<8x1xf32>
    %32 = arith.divf %30, %31 : vector<8x1xf32>
    %33 = vector.broadcast %25 : vector<8x1xf32> to vector<8x32xf32>
    %34 = arith.subf %9, %33 : vector<8x32xf32>
    %cst_37 = arith.constant 9.99999974E-6 : f32
    %35 = vector.broadcast %cst_37 : f32 to vector<8x1xf32>
    %36 = arith.addf %32, %35 : vector<8x1xf32>
    %37 = math.rsqrt %36 : vector<8x1xf32>
    %38 = vector.broadcast %37 : vector<8x1xf32> to vector<8x32xf32>
    %39 = arith.mulf %34, %38 : vector<8x32xf32>
    %40 = vector.broadcast %10 : vector<1x32xf32> to vector<8x32xf32>
    %41 = arith.mulf %39, %40 : vector<8x32xf32>
    %42 = vector.broadcast %11 : vector<1x32xf32> to vector<8x32xf32>
    %43 = arith.addf %41, %42 : vector<8x32xf32>
    %cst_38 = arith.constant dense<0.000000e+00> : vector<8x96xf32>
    %44 = tpu.matmul %43, %12, %cst_38 {dimension_numbers = #tpu.dot_dimension_numbers<[1], [0], [0], [1], [0, 0, 1, 1], [], []>} : vector<8x32xf32>, vector<32x96xf32>, vector<8x96xf32> -> vector<8x96xf32>
    %45 = vector.broadcast %13 : vector<1x96xf32> to vector<8x96xf32>
    %46 = arith.addf %44, %45 : vector<8x96xf32>
    %47 = vector.extract_strided_slice %46 {offsets = [0, 0], sizes = [8, 32], strides = [1, 1]} : vector<8x96xf32> to vector<8x32xf32>
    %48 = vector.extract_strided_slice %46 {offsets = [0, 32], sizes = [8, 32], strides = [1, 1]} : vector<8x96xf32> to vector<8x32xf32>
    %49 = vector.extract_strided_slice %46 {offsets = [0, 64], sizes = [8, 32], strides = [1, 1]} : vector<8x96xf32> to vector<8x32xf32>
    %50 = vector.extract_strided_slice %47 {offsets = [0, 0], sizes = [4, 8], strides = [1, 1]} : vector<8x32xf32> to vector<4x8xf32>
    %51 = vector.extract_strided_slice %48 {offsets = [0, 0], sizes = [4, 8], strides = [1, 1]} : vector<8x32xf32> to vector<4x8xf32>
    %52 = vector.extract_strided_slice %49 {offsets = [0, 0], sizes = [4, 8], strides = [1, 1]} : vector<8x32xf32> to vector<4x8xf32>
    "tpu.trace_start"() <{level = 10 : i32, message = "qd,kd->qk"}> : () -> ()
    %cst_39 = arith.constant dense<0.000000e+00> : vector<4x4xf32>
    %53 = tpu.matmul %50, %51, %cst_39 {dimension_numbers = #tpu.dot_dimension_numbers<[1], [1], [0], [0], [0, 0, 1, 0], [], []>} : vector<4x8xf32>, vector<4x8xf32>, vector<4x4xf32> -> vector<4x4xf32>
    "tpu.trace_stop"() : () -> ()
    %cst_40 = arith.constant 0.353553385 : f32
    %54 = vector.broadcast %cst_40 : f32 to vector<4x4xf32>
    %55 = arith.mulf %53, %54 : vector<4x4xf32>
    %cst_41 = arith.constant dense<0xFF800000> : vector<4xf32>
    %56 = vector.multi_reduction <maximumf>, %55, %cst_41 [1] : vector<4x4xf32> to vector<4xf32>
    %57 = vector.shape_cast %56 : vector<4xf32> to vector<4x1xf32>
    %58 = vector.broadcast %57 : vector<4x1xf32> to vector<4x4xf32>
    %59 = arith.subf %55, %58 : vector<4x4xf32>
    %60 = math.exp %59 : vector<4x4xf32>
    %cst_42 = arith.constant dense<0.000000e+00> : vector<4xf32>
    %61 = vector.multi_reduction <add>, %60, %cst_42 [1] : vector<4x4xf32> to vector<4xf32>
    %62 = vector.shape_cast %61 : vector<4xf32> to vector<4x1xf32>
    %cst_43 = arith.constant dense<0.000000e+00> : vector<4x8xf32>
    %63 = tpu.matmul %60, %52, %cst_43 {dimension_numbers = #tpu.dot_dimension_numbers<[1], [0], [0], [1], [0, 0, 1, 1], [], []>} : vector<4x4xf32>, vector<4x8xf32>, vector<4x8xf32> -> vector<4x8xf32>
    %64 = tpu.reciprocal %62 {approx = true} : vector<4x1xf32> -> vector<4x1xf32>
    %65 = vector.broadcast %64 : vector<4x1xf32> to vector<4x8xf32>
    %66 = arith.mulf %63, %65 : vector<4x8xf32>
    %67 = vector.extract_strided_slice %47 {offsets = [0, 8], sizes = [4, 8], strides = [1, 1]} : vector<8x32xf32> to vector<4x8xf32>
    %68 = vector.extract_strided_slice %48 {offsets = [0, 8], sizes = [4, 8], strides = [1, 1]} : vector<8x32xf32> to vector<4x8xf32>
    %69 = vector.extract_strided_slice %49 {offsets = [0, 8], sizes = [4, 8], strides = [1, 1]} : vector<8x32xf32> to vector<4x8xf32>
    "tpu.trace_start"() <{level = 10 : i32, message = "qd,kd->qk"}> : () -> ()
    %cst_44 = arith.constant dense<0.000000e+00> : vector<4x4xf32>
    %70 = tpu.matmul %67, %68, %cst_44 {dimension_numbers = #tpu.dot_dimension_numbers<[1], [1], [0], [0], [0, 0, 1, 0], [], []>} : vector<4x8xf32>, vector<4x8xf32>, vector<4x4xf32> -> vector<4x4xf32>
    "tpu.trace_stop"() : () -> ()
    %cst_45 = arith.constant 0.353553385 : f32
    %71 = vector.broadcast %cst_45 : f32 to vector<4x4xf32>
    %72 = arith.mulf %70, %71 : vector<4x4xf32>
    %cst_46 = arith.constant dense<0xFF800000> : vector<4xf32>
    %73 = vector.multi_reduction <maximumf>, %72, %cst_46 [1] : vector<4x4xf32> to vector<4xf32>
    %74 = vector.shape_cast %73 : vector<4xf32> to vector<4x1xf32>
    %75 = vector.broadcast %74 : vector<4x1xf32> to vector<4x4xf32>
    %76 = arith.subf %72, %75 : vector<4x4xf32>
    %77 = math.exp %76 : vector<4x4xf32>
    %cst_47 = arith.constant dense<0.000000e+00> : vector<4xf32>
    %78 = vector.multi_reduction <add>, %77, %cst_47 [1] : vector<4x4xf32> to vector<4xf32>
    %79 = vector.shape_cast %78 : vector<4xf32> to vector<4x1xf32>
    %cst_48 = arith.constant dense<0.000000e+00> : vector<4x8xf32>
    %80 = tpu.matmul %77, %69, %cst_48 {dimension_numbers = #tpu.dot_dimension_numbers<[1], [0], [0], [1], [0, 0, 1, 1], [], []>} : vector<4x4xf32>, vector<4x8xf32>, vector<4x8xf32> -> vector<4x8xf32>
    %81 = tpu.reciprocal %79 {approx = true} : vector<4x1xf32> -> vector<4x1xf32>
    %82 = vector.broadcast %81 : vector<4x1xf32> to vector<4x8xf32>
    %83 = arith.mulf %80, %82 : vector<4x8xf32>
    %84 = vector.extract_strided_slice %47 {offsets = [0, 16], sizes = [4, 8], strides = [1, 1]} : vector<8x32xf32> to vector<4x8xf32>
    %85 = vector.extract_strided_slice %48 {offsets = [0, 16], sizes = [4, 8], strides = [1, 1]} : vector<8x32xf32> to vector<4x8xf32>
    %86 = vector.extract_strided_slice %49 {offsets = [0, 16], sizes = [4, 8], strides = [1, 1]} : vector<8x32xf32> to vector<4x8xf32>
    "tpu.trace_start"() <{level = 10 : i32, message = "qd,kd->qk"}> : () -> ()
    %cst_49 = arith.constant dense<0.000000e+00> : vector<4x4xf32>
    %87 = tpu.matmul %84, %85, %cst_49 {dimension_numbers = #tpu.dot_dimension_numbers<[1], [1], [0], [0], [0, 0, 1, 0], [], []>} : vector<4x8xf32>, vector<4x8xf32>, vector<4x4xf32> -> vector<4x4xf32>
    "tpu.trace_stop"() : () -> ()
    %cst_50 = arith.constant 0.353553385 : f32
    %88 = vector.broadcast %cst_50 : f32 to vector<4x4xf32>
    %89 = arith.mulf %87, %88 : vector<4x4xf32>
    %cst_51 = arith.constant dense<0xFF800000> : vector<4xf32>
    %90 = vector.multi_reduction <maximumf>, %89, %cst_51 [1] : vector<4x4xf32> to vector<4xf32>
    %91 = vector.shape_cast %90 : vector<4xf32> to vector<4x1xf32>
    %92 = vector.broadcast %91 : vector<4x1xf32> to vector<4x4xf32>
    %93 = arith.subf %89, %92 : vector<4x4xf32>
    %94 = math.exp %93 : vector<4x4xf32>
    %cst_52 = arith.constant dense<0.000000e+00> : vector<4xf32>
    %95 = vector.multi_reduction <add>, %94, %cst_52 [1] : vector<4x4xf32> to vector<4xf32>
    %96 = vector.shape_cast %95 : vector<4xf32> to vector<4x1xf32>
    %cst_53 = arith.constant dense<0.000000e+00> : vector<4x8xf32>
    %97 = tpu.matmul %94, %86, %cst_53 {dimension_numbers = #tpu.dot_dimension_numbers<[1], [0], [0], [1], [0, 0, 1, 1], [], []>} : vector<4x4xf32>, vector<4x8xf32>, vector<4x8xf32> -> vector<4x8xf32>
    %98 = tpu.reciprocal %96 {approx = true} : vector<4x1xf32> -> vector<4x1xf32>
    %99 = vector.broadcast %98 : vector<4x1xf32> to vector<4x8xf32>
    %100 = arith.mulf %97, %99 : vector<4x8xf32>
    %101 = vector.extract_strided_slice %47 {offsets = [0, 24], sizes = [4, 8], strides = [1, 1]} : vector<8x32xf32> to vector<4x8xf32>
    %102 = vector.extract_strided_slice %48 {offsets = [0, 24], sizes = [4, 8], strides = [1, 1]} : vector<8x32xf32> to vector<4x8xf32>
    %103 = vector.extract_strided_slice %49 {offsets = [0, 24], sizes = [4, 8], strides = [1, 1]} : vector<8x32xf32> to vector<4x8xf32>
    "tpu.trace_start"() <{level = 10 : i32, message = "qd,kd->qk"}> : () -> ()
    %cst_54 = arith.constant dense<0.000000e+00> : vector<4x4xf32>
    %104 = tpu.matmul %101, %102, %cst_54 {dimension_numbers = #tpu.dot_dimension_numbers<[1], [1], [0], [0], [0, 0, 1, 0], [], []>} : vector<4x8xf32>, vector<4x8xf32>, vector<4x4xf32> -> vector<4x4xf32>
    "tpu.trace_stop"() : () -> ()
    %cst_55 = arith.constant 0.353553385 : f32
    %105 = vector.broadcast %cst_55 : f32 to vector<4x4xf32>
    %106 = arith.mulf %104, %105 : vector<4x4xf32>
    %cst_56 = arith.constant dense<0xFF800000> : vector<4xf32>
    %107 = vector.multi_reduction <maximumf>, %106, %cst_56 [1] : vector<4x4xf32> to vector<4xf32>
    %108 = vector.shape_cast %107 : vector<4xf32> to vector<4x1xf32>
    %109 = vector.broadcast %108 : vector<4x1xf32> to vector<4x4xf32>
    %110 = arith.subf %106, %109 : vector<4x4xf32>
    %111 = math.exp %110 : vector<4x4xf32>
    %cst_57 = arith.constant dense<0.000000e+00> : vector<4xf32>
    %112 = vector.multi_reduction <add>, %111, %cst_57 [1] : vector<4x4xf32> to vector<4xf32>
    %113 = vector.shape_cast %112 : vector<4xf32> to vector<4x1xf32>
    %cst_58 = arith.constant dense<0.000000e+00> : vector<4x8xf32>
    %114 = tpu.matmul %111, %103, %cst_58 {dimension_numbers = #tpu.dot_dimension_numbers<[1], [0], [0], [1], [0, 0, 1, 1], [], []>} : vector<4x4xf32>, vector<4x8xf32>, vector<4x8xf32> -> vector<4x8xf32>
    %115 = tpu.reciprocal %113 {approx = true} : vector<4x1xf32> -> vector<4x1xf32>
    %116 = vector.broadcast %115 : vector<4x1xf32> to vector<4x8xf32>
    %117 = arith.mulf %114, %116 : vector<4x8xf32>
    %118 = tpu.concatenate %66, %83, %100, %117 in 1 : vector<4x8xf32>, vector<4x8xf32>, vector<4x8xf32>, vector<4x8xf32> -> vector<4x32xf32>
    %119 = vector.extract_strided_slice %47 {offsets = [4, 0], sizes = [4, 8], strides = [1, 1]} : vector<8x32xf32> to vector<4x8xf32>
    %120 = vector.extract_strided_slice %48 {offsets = [4, 0], sizes = [4, 8], strides = [1, 1]} : vector<8x32xf32> to vector<4x8xf32>
    %121 = vector.extract_strided_slice %49 {offsets = [4, 0], sizes = [4, 8], strides = [1, 1]} : vector<8x32xf32> to vector<4x8xf32>
    "tpu.trace_start"() <{level = 10 : i32, message = "qd,kd->qk"}> : () -> ()
    %cst_59 = arith.constant dense<0.000000e+00> : vector<4x4xf32>
    %122 = tpu.matmul %119, %120, %cst_59 {dimension_numbers = #tpu.dot_dimension_numbers<[1], [1], [0], [0], [0, 0, 1, 0], [], []>} : vector<4x8xf32>, vector<4x8xf32>, vector<4x4xf32> -> vector<4x4xf32>
    "tpu.trace_stop"() : () -> ()
    %cst_60 = arith.constant 0.353553385 : f32
    %123 = vector.broadcast %cst_60 : f32 to vector<4x4xf32>
    %124 = arith.mulf %122, %123 : vector<4x4xf32>
    %cst_61 = arith.constant dense<0xFF800000> : vector<4xf32>
    %125 = vector.multi_reduction <maximumf>, %124, %cst_61 [1] : vector<4x4xf32> to vector<4xf32>
    %126 = vector.shape_cast %125 : vector<4xf32> to vector<4x1xf32>
    %127 = vector.broadcast %126 : vector<4x1xf32> to vector<4x4xf32>
    %128 = arith.subf %124, %127 : vector<4x4xf32>
    %129 = math.exp %128 : vector<4x4xf32>
    %cst_62 = arith.constant dense<0.000000e+00> : vector<4xf32>
    %130 = vector.multi_reduction <add>, %129, %cst_62 [1] : vector<4x4xf32> to vector<4xf32>
    %131 = vector.shape_cast %130 : vector<4xf32> to vector<4x1xf32>
    %cst_63 = arith.constant dense<0.000000e+00> : vector<4x8xf32>
    %132 = tpu.matmul %129, %121, %cst_63 {dimension_numbers = #tpu.dot_dimension_numbers<[1], [0], [0], [1], [0, 0, 1, 1], [], []>} : vector<4x4xf32>, vector<4x8xf32>, vector<4x8xf32> -> vector<4x8xf32>
    %133 = tpu.reciprocal %131 {approx = true} : vector<4x1xf32> -> vector<4x1xf32>
    %134 = vector.broadcast %133 : vector<4x1xf32> to vector<4x8xf32>
    %135 = arith.mulf %132, %134 : vector<4x8xf32>
    %136 = vector.extract_strided_slice %47 {offsets = [4, 8], sizes = [4, 8], strides = [1, 1]} : vector<8x32xf32> to vector<4x8xf32>
    %137 = vector.extract_strided_slice %48 {offsets = [4, 8], sizes = [4, 8], strides = [1, 1]} : vector<8x32xf32> to vector<4x8xf32>
    %138 = vector.extract_strided_slice %49 {offsets = [4, 8], sizes = [4, 8], strides = [1, 1]} : vector<8x32xf32> to vector<4x8xf32>
    "tpu.trace_start"() <{level = 10 : i32, message = "qd,kd->qk"}> : () -> ()
    %cst_64 = arith.constant dense<0.000000e+00> : vector<4x4xf32>
    %139 = tpu.matmul %136, %137, %cst_64 {dimension_numbers = #tpu.dot_dimension_numbers<[1], [1], [0], [0], [0, 0, 1, 0], [], []>} : vector<4x8xf32>, vector<4x8xf32>, vector<4x4xf32> -> vector<4x4xf32>
    "tpu.trace_stop"() : () -> ()
    %cst_65 = arith.constant 0.353553385 : f32
    %140 = vector.broadcast %cst_65 : f32 to vector<4x4xf32>
    %141 = arith.mulf %139, %140 : vector<4x4xf32>
    %cst_66 = arith.constant dense<0xFF800000> : vector<4xf32>
    %142 = vector.multi_reduction <maximumf>, %141, %cst_66 [1] : vector<4x4xf32> to vector<4xf32>
    %143 = vector.shape_cast %142 : vector<4xf32> to vector<4x1xf32>
    %144 = vector.broadcast %143 : vector<4x1xf32> to vector<4x4xf32>
    %145 = arith.subf %141, %144 : vector<4x4xf32>
    %146 = math.exp %145 : vector<4x4xf32>
    %cst_67 = arith.constant dense<0.000000e+00> : vector<4xf32>
    %147 = vector.multi_reduction <add>, %146, %cst_67 [1] : vector<4x4xf32> to vector<4xf32>
    %148 = vector.shape_cast %147 : vector<4xf32> to vector<4x1xf32>
    %cst_68 = arith.constant dense<0.000000e+00> : vector<4x8xf32>
    %149 = tpu.matmul %146, %138, %cst_68 {dimension_numbers = #tpu.dot_dimension_numbers<[1], [0], [0], [1], [0, 0, 1, 1], [], []>} : vector<4x4xf32>, vector<4x8xf32>, vector<4x8xf32> -> vector<4x8xf32>
    %150 = tpu.reciprocal %148 {approx = true} : vector<4x1xf32> -> vector<4x1xf32>
    %151 = vector.broadcast %150 : vector<4x1xf32> to vector<4x8xf32>
    %152 = arith.mulf %149, %151 : vector<4x8xf32>
    %153 = vector.extract_strided_slice %47 {offsets = [4, 16], sizes = [4, 8], strides = [1, 1]} : vector<8x32xf32> to vector<4x8xf32>
    %154 = vector.extract_strided_slice %48 {offsets = [4, 16], sizes = [4, 8], strides = [1, 1]} : vector<8x32xf32> to vector<4x8xf32>
    %155 = vector.extract_strided_slice %49 {offsets = [4, 16], sizes = [4, 8], strides = [1, 1]} : vector<8x32xf32> to vector<4x8xf32>
    "tpu.trace_start"() <{level = 10 : i32, message = "qd,kd->qk"}> : () -> ()
    %cst_69 = arith.constant dense<0.000000e+00> : vector<4x4xf32>
    %156 = tpu.matmul %153, %154, %cst_69 {dimension_numbers = #tpu.dot_dimension_numbers<[1], [1], [0], [0], [0, 0, 1, 0], [], []>} : vector<4x8xf32>, vector<4x8xf32>, vector<4x4xf32> -> vector<4x4xf32>
    "tpu.trace_stop"() : () -> ()
    %cst_70 = arith.constant 0.353553385 : f32
    %157 = vector.broadcast %cst_70 : f32 to vector<4x4xf32>
    %158 = arith.mulf %156, %157 : vector<4x4xf32>
    %cst_71 = arith.constant dense<0xFF800000> : vector<4xf32>
    %159 = vector.multi_reduction <maximumf>, %158, %cst_71 [1] : vector<4x4xf32> to vector<4xf32>
    %160 = vector.shape_cast %159 : vector<4xf32> to vector<4x1xf32>
    %161 = vector.broadcast %160 : vector<4x1xf32> to vector<4x4xf32>
    %162 = arith.subf %158, %161 : vector<4x4xf32>
    %163 = math.exp %162 : vector<4x4xf32>
    %cst_72 = arith.constant dense<0.000000e+00> : vector<4xf32>
    %164 = vector.multi_reduction <add>, %163, %cst_72 [1] : vector<4x4xf32> to vector<4xf32>
    %165 = vector.shape_cast %164 : vector<4xf32> to vector<4x1xf32>
    %cst_73 = arith.constant dense<0.000000e+00> : vector<4x8xf32>
    %166 = tpu.matmul %163, %155, %cst_73 {dimension_numbers = #tpu.dot_dimension_numbers<[1], [0], [0], [1], [0, 0, 1, 1], [], []>} : vector<4x4xf32>, vector<4x8xf32>, vector<4x8xf32> -> vector<4x8xf32>
    %167 = tpu.reciprocal %165 {approx = true} : vector<4x1xf32> -> vector<4x1xf32>
    %168 = vector.broadcast %167 : vector<4x1xf32> to vector<4x8xf32>
    %169 = arith.mulf %166, %168 : vector<4x8xf32>
    %170 = vector.extract_strided_slice %47 {offsets = [4, 24], sizes = [4, 8], strides = [1, 1]} : vector<8x32xf32> to vector<4x8xf32>
    %171 = vector.extract_strided_slice %48 {offsets = [4, 24], sizes = [4, 8], strides = [1, 1]} : vector<8x32xf32> to vector<4x8xf32>
    %172 = vector.extract_strided_slice %49 {offsets = [4, 24], sizes = [4, 8], strides = [1, 1]} : vector<8x32xf32> to vector<4x8xf32>
    "tpu.trace_start"() <{level = 10 : i32, message = "qd,kd->qk"}> : () -> ()
    %cst_74 = arith.constant dense<0.000000e+00> : vector<4x4xf32>
    %173 = tpu.matmul %170, %171, %cst_74 {dimension_numbers = #tpu.dot_dimension_numbers<[1], [1], [0], [0], [0, 0, 1, 0], [], []>} : vector<4x8xf32>, vector<4x8xf32>, vector<4x4xf32> -> vector<4x4xf32>
    "tpu.trace_stop"() : () -> ()
    %cst_75 = arith.constant 0.353553385 : f32
    %174 = vector.broadcast %cst_75 : f32 to vector<4x4xf32>
    %175 = arith.mulf %173, %174 : vector<4x4xf32>
    %cst_76 = arith.constant dense<0xFF800000> : vector<4xf32>
    %176 = vector.multi_reduction <maximumf>, %175, %cst_76 [1] : vector<4x4xf32> to vector<4xf32>
    %177 = vector.shape_cast %176 : vector<4xf32> to vector<4x1xf32>
    %178 = vector.broadcast %177 : vector<4x1xf32> to vector<4x4xf32>
    %179 = arith.subf %175, %178 : vector<4x4xf32>
    %180 = math.exp %179 : vector<4x4xf32>
    %cst_77 = arith.constant dense<0.000000e+00> : vector<4xf32>
    %181 = vector.multi_reduction <add>, %180, %cst_77 [1] : vector<4x4xf32> to vector<4xf32>
    %182 = vector.shape_cast %181 : vector<4xf32> to vector<4x1xf32>
    %cst_78 = arith.constant dense<0.000000e+00> : vector<4x8xf32>
    %183 = tpu.matmul %180, %172, %cst_78 {dimension_numbers = #tpu.dot_dimension_numbers<[1], [0], [0], [1], [0, 0, 1, 1], [], []>} : vector<4x4xf32>, vector<4x8xf32>, vector<4x8xf32> -> vector<4x8xf32>
    %184 = tpu.reciprocal %182 {approx = true} : vector<4x1xf32> -> vector<4x1xf32>
    %185 = vector.broadcast %184 : vector<4x1xf32> to vector<4x8xf32>
    %186 = arith.mulf %183, %185 : vector<4x8xf32>
    %187 = tpu.concatenate %135, %152, %169, %186 in 1 : vector<4x8xf32>, vector<4x8xf32>, vector<4x8xf32>, vector<4x8xf32> -> vector<4x32xf32>
    %188 = tpu.concatenate %118, %187 in 0 : vector<4x32xf32>, vector<4x32xf32> -> vector<8x32xf32>
    %cst_79 = arith.constant dense<0.000000e+00> : vector<8x32xf32>
    %189 = tpu.matmul %188, %14, %cst_79 {dimension_numbers = #tpu.dot_dimension_numbers<[1], [0], [0], [1], [0, 0, 1, 1], [], []>} : vector<8x32xf32>, vector<32x32xf32>, vector<8x32xf32> -> vector<8x32xf32>
    %190 = arith.addf %9, %189 : vector<8x32xf32>
    %191 = vector.broadcast %15 : vector<1x32xf32> to vector<8x32xf32>
    %192 = arith.addf %190, %191 : vector<8x32xf32>
    %cst_80 = arith.constant dense<0.000000e+00> : vector<8xf32>
    %193 = vector.multi_reduction <add>, %192, %cst_80 [1] : vector<8x32xf32> to vector<8xf32>
    %194 = vector.shape_cast %193 : vector<8xf32> to vector<8x1xf32>
    %cst_81 = arith.constant 3.200000e+01 : f32
    %195 = vector.broadcast %cst_81 : f32 to vector<8x1xf32>
    %196 = arith.divf %194, %195 : vector<8x1xf32>
    %197 = vector.broadcast %196 : vector<8x1xf32> to vector<8x32xf32>
    %198 = arith.subf %192, %197 : vector<8x32xf32>
    %199 = arith.mulf %198, %198 : vector<8x32xf32>
    %cst_82 = arith.constant dense<0.000000e+00> : vector<8xf32>
    %200 = vector.multi_reduction <add>, %199, %cst_82 [1] : vector<8x32xf32> to vector<8xf32>
    %201 = vector.shape_cast %200 : vector<8xf32> to vector<8x1xf32>
    %cst_83 = arith.constant 3.200000e+01 : f32
    %202 = vector.broadcast %cst_83 : f32 to vector<8x1xf32>
    %203 = arith.divf %201, %202 : vector<8x1xf32>
    %204 = vector.broadcast %196 : vector<8x1xf32> to vector<8x32xf32>
    %205 = arith.subf %192, %204 : vector<8x32xf32>
    %cst_84 = arith.constant 9.99999974E-6 : f32
    %206 = vector.broadcast %cst_84 : f32 to vector<8x1xf32>
    %207 = arith.addf %203, %206 : vector<8x1xf32>
    %208 = math.rsqrt %207 : vector<8x1xf32>
    %209 = vector.broadcast %208 : vector<8x1xf32> to vector<8x32xf32>
    %210 = arith.mulf %205, %209 : vector<8x32xf32>
    %211 = vector.broadcast %16 : vector<1x32xf32> to vector<8x32xf32>
    %212 = arith.mulf %210, %211 : vector<8x32xf32>
    %213 = vector.broadcast %17 : vector<1x32xf32> to vector<8x32xf32>
    %214 = arith.addf %212, %213 : vector<8x32xf32>
    %cst_85 = arith.constant dense<0.000000e+00> : vector<8x64xf32>
    %215 = tpu.matmul %214, %18, %cst_85 {dimension_numbers = #tpu.dot_dimension_numbers<[1], [0], [0], [1], [0, 0, 1, 1], [], []>} : vector<8x32xf32>, vector<32x64xf32>, vector<8x64xf32> -> vector<8x64xf32>
    %216 = vector.broadcast %19 : vector<1x64xf32> to vector<8x64xf32>
    %217 = arith.addf %215, %216 : vector<8x64xf32>
    %218 = arith.mulf %217, %217 : vector<8x64xf32>
    %219 = arith.mulf %217, %218 : vector<8x64xf32>
    %cst_86 = arith.constant 4.471500e-02 : f32
    %220 = vector.broadcast %cst_86 : f32 to vector<8x64xf32>
    %221 = arith.mulf %220, %219 : vector<8x64xf32>
    %222 = arith.addf %217, %221 : vector<8x64xf32>
    %cst_87 = arith.constant 0.797884583 : f32
    %223 = vector.broadcast %cst_87 : f32 to vector<8x64xf32>
    %224 = arith.mulf %223, %222 : vector<8x64xf32>
    %225 = math.tanh %224 : vector<8x64xf32>
    %cst_88 = arith.constant 1.000000e+00 : f32
    %226 = vector.broadcast %cst_88 : f32 to vector<8x64xf32>
    %227 = arith.addf %226, %225 : vector<8x64xf32>
    %cst_89 = arith.constant 5.000000e-01 : f32
    %228 = vector.broadcast %cst_89 : f32 to vector<8x64xf32>
    %229 = arith.mulf %228, %227 : vector<8x64xf32>
    %230 = arith.mulf %217, %229 : vector<8x64xf32>
    %cst_90 = arith.constant dense<0.000000e+00> : vector<8x32xf32>
    %231 = tpu.matmul %230, %20, %cst_90 {dimension_numbers = #tpu.dot_dimension_numbers<[1], [0], [0], [1], [0, 0, 1, 1], [], []>} : vector<8x64xf32>, vector<64x32xf32>, vector<8x32xf32> -> vector<8x32xf32>
    %232 = arith.addf %192, %231 : vector<8x32xf32>
    %233 = vector.broadcast %21 : vector<1x32xf32> to vector<8x32xf32>
    %234 = arith.addf %232, %233 : vector<8x32xf32>
    %c0_91 = arith.constant 0 : index
    %c0_92 = arith.constant 0 : index
    %235 = vector.load %arg17[%c0_91, %c0_92] : memref<1x32xf32, #tpu.memory_space<vmem>>, vector<1x32xf32>
    %c0_93 = arith.constant 0 : index
    %c0_94 = arith.constant 0 : index
    %236 = vector.load %arg18[%c0_93, %c0_94] : memref<1x32xf32, #tpu.memory_space<vmem>>, vector<1x32xf32>
    %c0_95 = arith.constant 0 : index
    %c0_96 = arith.constant 0 : index
    %237 = vector.load %arg19[%c0_95, %c0_96] : memref<32x96xf32, #tpu.memory_space<vmem>>, vector<32x96xf32>
    %c0_97 = arith.constant 0 : index
    %c0_98 = arith.constant 0 : index
    %238 = vector.load %arg20[%c0_97, %c0_98] : memref<1x96xf32, #tpu.memory_space<vmem>>, vector<1x96xf32>
    %c0_99 = arith.constant 0 : index
    %c0_100 = arith.constant 0 : index
    %239 = vector.load %arg21[%c0_99, %c0_100] : memref<32x32xf32, #tpu.memory_space<vmem>>, vector<32x32xf32>
    %c0_101 = arith.constant 0 : index
    %c0_102 = arith.constant 0 : index
    %240 = vector.load %arg22[%c0_101, %c0_102] : memref<1x32xf32, #tpu.memory_space<vmem>>, vector<1x32xf32>
    %c0_103 = arith.constant 0 : index
    %c0_104 = arith.constant 0 : index
    %241 = vector.load %arg23[%c0_103, %c0_104] : memref<1x32xf32, #tpu.memory_space<vmem>>, vector<1x32xf32>
    %c0_105 = arith.constant 0 : index
    %c0_106 = arith.constant 0 : index
    %242 = vector.load %arg24[%c0_105, %c0_106] : memref<1x32xf32, #tpu.memory_space<vmem>>, vector<1x32xf32>
    %c0_107 = arith.constant 0 : index
    %c0_108 = arith.constant 0 : index
    %243 = vector.load %arg25[%c0_107, %c0_108] : memref<32x64xf32, #tpu.memory_space<vmem>>, vector<32x64xf32>
    %c0_109 = arith.constant 0 : index
    %c0_110 = arith.constant 0 : index
    %244 = vector.load %arg26[%c0_109, %c0_110] : memref<1x64xf32, #tpu.memory_space<vmem>>, vector<1x64xf32>
    %c0_111 = arith.constant 0 : index
    %c0_112 = arith.constant 0 : index
    %245 = vector.load %arg27[%c0_111, %c0_112] : memref<64x32xf32, #tpu.memory_space<vmem>>, vector<64x32xf32>
    %c0_113 = arith.constant 0 : index
    %c0_114 = arith.constant 0 : index
    %246 = vector.load %arg28[%c0_113, %c0_114] : memref<1x32xf32, #tpu.memory_space<vmem>>, vector<1x32xf32>
    %cst_115 = arith.constant dense<0.000000e+00> : vector<8xf32>
    %247 = vector.multi_reduction <add>, %234, %cst_115 [1] : vector<8x32xf32> to vector<8xf32>
    %248 = vector.shape_cast %247 : vector<8xf32> to vector<8x1xf32>
    %cst_116 = arith.constant 3.200000e+01 : f32
    %249 = vector.broadcast %cst_116 : f32 to vector<8x1xf32>
    %250 = arith.divf %248, %249 : vector<8x1xf32>
    %251 = vector.broadcast %250 : vector<8x1xf32> to vector<8x32xf32>
    %252 = arith.subf %234, %251 : vector<8x32xf32>
    %253 = arith.mulf %252, %252 : vector<8x32xf32>
    %cst_117 = arith.constant dense<0.000000e+00> : vector<8xf32>
    %254 = vector.multi_reduction <add>, %253, %cst_117 [1] : vector<8x32xf32> to vector<8xf32>
    %255 = vector.shape_cast %254 : vector<8xf32> to vector<8x1xf32>
    %cst_118 = arith.constant 3.200000e+01 : f32
    %256 = vector.broadcast %cst_118 : f32 to vector<8x1xf32>
    %257 = arith.divf %255, %256 : vector<8x1xf32>
    %258 = vector.broadcast %250 : vector<8x1xf32> to vector<8x32xf32>
    %259 = arith.subf %234, %258 : vector<8x32xf32>
    %cst_119 = arith.constant 9.99999974E-6 : f32
    %260 = vector.broadcast %cst_119 : f32 to vector<8x1xf32>
    %261 = arith.addf %257, %260 : vector<8x1xf32>
    %262 = math.rsqrt %261 : vector<8x1xf32>
    %263 = vector.broadcast %262 : vector<8x1xf32> to vector<8x32xf32>
    %264 = arith.mulf %259, %263 : vector<8x32xf32>
    %265 = vector.broadcast %235 : vector<1x32xf32> to vector<8x32xf32>
    %266 = arith.mulf %264, %265 : vector<8x32xf32>
    %267 = vector.broadcast %236 : vector<1x32xf32> to vector<8x32xf32>
    %268 = arith.addf %266, %267 : vector<8x32xf32>
    %cst_120 = arith.constant dense<0.000000e+00> : vector<8x96xf32>
    %269 = tpu.matmul %268, %237, %cst_120 {dimension_numbers = #tpu.dot_dimension_numbers<[1], [0], [0], [1], [0, 0, 1, 1], [], []>} : vector<8x32xf32>, vector<32x96xf32>, vector<8x96xf32> -> vector<8x96xf32>
    %270 = vector.broadcast %238 : vector<1x96xf32> to vector<8x96xf32>
    %271 = arith.addf %269, %270 : vector<8x96xf32>
    %272 = vector.extract_strided_slice %271 {offsets = [0, 0], sizes = [8, 32], strides = [1, 1]} : vector<8x96xf32> to vector<8x32xf32>
    %273 = vector.extract_strided_slice %271 {offsets = [0, 32], sizes = [8, 32], strides = [1, 1]} : vector<8x96xf32> to vector<8x32xf32>
    %274 = vector.extract_strided_slice %271 {offsets = [0, 64], sizes = [8, 32], strides = [1, 1]} : vector<8x96xf32> to vector<8x32xf32>
    %275 = vector.extract_strided_slice %272 {offsets = [0, 0], sizes = [4, 8], strides = [1, 1]} : vector<8x32xf32> to vector<4x8xf32>
    %276 = vector.extract_strided_slice %273 {offsets = [0, 0], sizes = [4, 8], strides = [1, 1]} : vector<8x32xf32> to vector<4x8xf32>
    %277 = vector.extract_strided_slice %274 {offsets = [0, 0], sizes = [4, 8], strides = [1, 1]} : vector<8x32xf32> to vector<4x8xf32>
    "tpu.trace_start"() <{level = 10 : i32, message = "qd,kd->qk"}> : () -> ()
    %cst_121 = arith.constant dense<0.000000e+00> : vector<4x4xf32>
    %278 = tpu.matmul %275, %276, %cst_121 {dimension_numbers = #tpu.dot_dimension_numbers<[1], [1], [0], [0], [0, 0, 1, 0], [], []>} : vector<4x8xf32>, vector<4x8xf32>, vector<4x4xf32> -> vector<4x4xf32>
    "tpu.trace_stop"() : () -> ()
    %cst_122 = arith.constant 0.353553385 : f32
    %279 = vector.broadcast %cst_122 : f32 to vector<4x4xf32>
    %280 = arith.mulf %278, %279 : vector<4x4xf32>
    %cst_123 = arith.constant dense<0xFF800000> : vector<4xf32>
    %281 = vector.multi_reduction <maximumf>, %280, %cst_123 [1] : vector<4x4xf32> to vector<4xf32>
    %282 = vector.shape_cast %281 : vector<4xf32> to vector<4x1xf32>
    %283 = vector.broadcast %282 : vector<4x1xf32> to vector<4x4xf32>
    %284 = arith.subf %280, %283 : vector<4x4xf32>
    %285 = math.exp %284 : vector<4x4xf32>
    %cst_124 = arith.constant dense<0.000000e+00> : vector<4xf32>
    %286 = vector.multi_reduction <add>, %285, %cst_124 [1] : vector<4x4xf32> to vector<4xf32>
    %287 = vector.shape_cast %286 : vector<4xf32> to vector<4x1xf32>
    %cst_125 = arith.constant dense<0.000000e+00> : vector<4x8xf32>
    %288 = tpu.matmul %285, %277, %cst_125 {dimension_numbers = #tpu.dot_dimension_numbers<[1], [0], [0], [1], [0, 0, 1, 1], [], []>} : vector<4x4xf32>, vector<4x8xf32>, vector<4x8xf32> -> vector<4x8xf32>
    %289 = tpu.reciprocal %287 {approx = true} : vector<4x1xf32> -> vector<4x1xf32>
    %290 = vector.broadcast %289 : vector<4x1xf32> to vector<4x8xf32>
    %291 = arith.mulf %288, %290 : vector<4x8xf32>
    %292 = vector.extract_strided_slice %272 {offsets = [0, 8], sizes = [4, 8], strides = [1, 1]} : vector<8x32xf32> to vector<4x8xf32>
    %293 = vector.extract_strided_slice %273 {offsets = [0, 8], sizes = [4, 8], strides = [1, 1]} : vector<8x32xf32> to vector<4x8xf32>
    %294 = vector.extract_strided_slice %274 {offsets = [0, 8], sizes = [4, 8], strides = [1, 1]} : vector<8x32xf32> to vector<4x8xf32>
    "tpu.trace_start"() <{level = 10 : i32, message = "qd,kd->qk"}> : () -> ()
    %cst_126 = arith.constant dense<0.000000e+00> : vector<4x4xf32>
    %295 = tpu.matmul %292, %293, %cst_126 {dimension_numbers = #tpu.dot_dimension_numbers<[1], [1], [0], [0], [0, 0, 1, 0], [], []>} : vector<4x8xf32>, vector<4x8xf32>, vector<4x4xf32> -> vector<4x4xf32>
    "tpu.trace_stop"() : () -> ()
    %cst_127 = arith.constant 0.353553385 : f32
    %296 = vector.broadcast %cst_127 : f32 to vector<4x4xf32>
    %297 = arith.mulf %295, %296 : vector<4x4xf32>
    %cst_128 = arith.constant dense<0xFF800000> : vector<4xf32>
    %298 = vector.multi_reduction <maximumf>, %297, %cst_128 [1] : vector<4x4xf32> to vector<4xf32>
    %299 = vector.shape_cast %298 : vector<4xf32> to vector<4x1xf32>
    %300 = vector.broadcast %299 : vector<4x1xf32> to vector<4x4xf32>
    %301 = arith.subf %297, %300 : vector<4x4xf32>
    %302 = math.exp %301 : vector<4x4xf32>
    %cst_129 = arith.constant dense<0.000000e+00> : vector<4xf32>
    %303 = vector.multi_reduction <add>, %302, %cst_129 [1] : vector<4x4xf32> to vector<4xf32>
    %304 = vector.shape_cast %303 : vector<4xf32> to vector<4x1xf32>
    %cst_130 = arith.constant dense<0.000000e+00> : vector<4x8xf32>
    %305 = tpu.matmul %302, %294, %cst_130 {dimension_numbers = #tpu.dot_dimension_numbers<[1], [0], [0], [1], [0, 0, 1, 1], [], []>} : vector<4x4xf32>, vector<4x8xf32>, vector<4x8xf32> -> vector<4x8xf32>
    %306 = tpu.reciprocal %304 {approx = true} : vector<4x1xf32> -> vector<4x1xf32>
    %307 = vector.broadcast %306 : vector<4x1xf32> to vector<4x8xf32>
    %308 = arith.mulf %305, %307 : vector<4x8xf32>
    %309 = vector.extract_strided_slice %272 {offsets = [0, 16], sizes = [4, 8], strides = [1, 1]} : vector<8x32xf32> to vector<4x8xf32>
    %310 = vector.extract_strided_slice %273 {offsets = [0, 16], sizes = [4, 8], strides = [1, 1]} : vector<8x32xf32> to vector<4x8xf32>
    %311 = vector.extract_strided_slice %274 {offsets = [0, 16], sizes = [4, 8], strides = [1, 1]} : vector<8x32xf32> to vector<4x8xf32>
    "tpu.trace_start"() <{level = 10 : i32, message = "qd,kd->qk"}> : () -> ()
    %cst_131 = arith.constant dense<0.000000e+00> : vector<4x4xf32>
    %312 = tpu.matmul %309, %310, %cst_131 {dimension_numbers = #tpu.dot_dimension_numbers<[1], [1], [0], [0], [0, 0, 1, 0], [], []>} : vector<4x8xf32>, vector<4x8xf32>, vector<4x4xf32> -> vector<4x4xf32>
    "tpu.trace_stop"() : () -> ()
    %cst_132 = arith.constant 0.353553385 : f32
    %313 = vector.broadcast %cst_132 : f32 to vector<4x4xf32>
    %314 = arith.mulf %312, %313 : vector<4x4xf32>
    %cst_133 = arith.constant dense<0xFF800000> : vector<4xf32>
    %315 = vector.multi_reduction <maximumf>, %314, %cst_133 [1] : vector<4x4xf32> to vector<4xf32>
    %316 = vector.shape_cast %315 : vector<4xf32> to vector<4x1xf32>
    %317 = vector.broadcast %316 : vector<4x1xf32> to vector<4x4xf32>
    %318 = arith.subf %314, %317 : vector<4x4xf32>
    %319 = math.exp %318 : vector<4x4xf32>
    %cst_134 = arith.constant dense<0.000000e+00> : vector<4xf32>
    %320 = vector.multi_reduction <add>, %319, %cst_134 [1] : vector<4x4xf32> to vector<4xf32>
    %321 = vector.shape_cast %320 : vector<4xf32> to vector<4x1xf32>
    %cst_135 = arith.constant dense<0.000000e+00> : vector<4x8xf32>
    %322 = tpu.matmul %319, %311, %cst_135 {dimension_numbers = #tpu.dot_dimension_numbers<[1], [0], [0], [1], [0, 0, 1, 1], [], []>} : vector<4x4xf32>, vector<4x8xf32>, vector<4x8xf32> -> vector<4x8xf32>
    %323 = tpu.reciprocal %321 {approx = true} : vector<4x1xf32> -> vector<4x1xf32>
    %324 = vector.broadcast %323 : vector<4x1xf32> to vector<4x8xf32>
    %325 = arith.mulf %322, %324 : vector<4x8xf32>
    %326 = vector.extract_strided_slice %272 {offsets = [0, 24], sizes = [4, 8], strides = [1, 1]} : vector<8x32xf32> to vector<4x8xf32>
    %327 = vector.extract_strided_slice %273 {offsets = [0, 24], sizes = [4, 8], strides = [1, 1]} : vector<8x32xf32> to vector<4x8xf32>
    %328 = vector.extract_strided_slice %274 {offsets = [0, 24], sizes = [4, 8], strides = [1, 1]} : vector<8x32xf32> to vector<4x8xf32>
    "tpu.trace_start"() <{level = 10 : i32, message = "qd,kd->qk"}> : () -> ()
    %cst_136 = arith.constant dense<0.000000e+00> : vector<4x4xf32>
    %329 = tpu.matmul %326, %327, %cst_136 {dimension_numbers = #tpu.dot_dimension_numbers<[1], [1], [0], [0], [0, 0, 1, 0], [], []>} : vector<4x8xf32>, vector<4x8xf32>, vector<4x4xf32> -> vector<4x4xf32>
    "tpu.trace_stop"() : () -> ()
    %cst_137 = arith.constant 0.353553385 : f32
    %330 = vector.broadcast %cst_137 : f32 to vector<4x4xf32>
    %331 = arith.mulf %329, %330 : vector<4x4xf32>
    %cst_138 = arith.constant dense<0xFF800000> : vector<4xf32>
    %332 = vector.multi_reduction <maximumf>, %331, %cst_138 [1] : vector<4x4xf32> to vector<4xf32>
    %333 = vector.shape_cast %332 : vector<4xf32> to vector<4x1xf32>
    %334 = vector.broadcast %333 : vector<4x1xf32> to vector<4x4xf32>
    %335 = arith.subf %331, %334 : vector<4x4xf32>
    %336 = math.exp %335 : vector<4x4xf32>
    %cst_139 = arith.constant dense<0.000000e+00> : vector<4xf32>
    %337 = vector.multi_reduction <add>, %336, %cst_139 [1] : vector<4x4xf32> to vector<4xf32>
    %338 = vector.shape_cast %337 : vector<4xf32> to vector<4x1xf32>
    %cst_140 = arith.constant dense<0.000000e+00> : vector<4x8xf32>
    %339 = tpu.matmul %336, %328, %cst_140 {dimension_numbers = #tpu.dot_dimension_numbers<[1], [0], [0], [1], [0, 0, 1, 1], [], []>} : vector<4x4xf32>, vector<4x8xf32>, vector<4x8xf32> -> vector<4x8xf32>
    %340 = tpu.reciprocal %338 {approx = true} : vector<4x1xf32> -> vector<4x1xf32>
    %341 = vector.broadcast %340 : vector<4x1xf32> to vector<4x8xf32>
    %342 = arith.mulf %339, %341 : vector<4x8xf32>
    %343 = tpu.concatenate %291, %308, %325, %342 in 1 : vector<4x8xf32>, vector<4x8xf32>, vector<4x8xf32>, vector<4x8xf32> -> vector<4x32xf32>
    %344 = vector.extract_strided_slice %272 {offsets = [4, 0], sizes = [4, 8], strides = [1, 1]} : vector<8x32xf32> to vector<4x8xf32>
    %345 = vector.extract_strided_slice %273 {offsets = [4, 0], sizes = [4, 8], strides = [1, 1]} : vector<8x32xf32> to vector<4x8xf32>
    %346 = vector.extract_strided_slice %274 {offsets = [4, 0], sizes = [4, 8], strides = [1, 1]} : vector<8x32xf32> to vector<4x8xf32>
    "tpu.trace_start"() <{level = 10 : i32, message = "qd,kd->qk"}> : () -> ()
    %cst_141 = arith.constant dense<0.000000e+00> : vector<4x4xf32>
    %347 = tpu.matmul %344, %345, %cst_141 {dimension_numbers = #tpu.dot_dimension_numbers<[1], [1], [0], [0], [0, 0, 1, 0], [], []>} : vector<4x8xf32>, vector<4x8xf32>, vector<4x4xf32> -> vector<4x4xf32>
    "tpu.trace_stop"() : () -> ()
    %cst_142 = arith.constant 0.353553385 : f32
    %348 = vector.broadcast %cst_142 : f32 to vector<4x4xf32>
    %349 = arith.mulf %347, %348 : vector<4x4xf32>
    %cst_143 = arith.constant dense<0xFF800000> : vector<4xf32>
    %350 = vector.multi_reduction <maximumf>, %349, %cst_143 [1] : vector<4x4xf32> to vector<4xf32>
    %351 = vector.shape_cast %350 : vector<4xf32> to vector<4x1xf32>
    %352 = vector.broadcast %351 : vector<4x1xf32> to vector<4x4xf32>
    %353 = arith.subf %349, %352 : vector<4x4xf32>
    %354 = math.exp %353 : vector<4x4xf32>
    %cst_144 = arith.constant dense<0.000000e+00> : vector<4xf32>
    %355 = vector.multi_reduction <add>, %354, %cst_144 [1] : vector<4x4xf32> to vector<4xf32>
    %356 = vector.shape_cast %355 : vector<4xf32> to vector<4x1xf32>
    %cst_145 = arith.constant dense<0.000000e+00> : vector<4x8xf32>
    %357 = tpu.matmul %354, %346, %cst_145 {dimension_numbers = #tpu.dot_dimension_numbers<[1], [0], [0], [1], [0, 0, 1, 1], [], []>} : vector<4x4xf32>, vector<4x8xf32>, vector<4x8xf32> -> vector<4x8xf32>
    %358 = tpu.reciprocal %356 {approx = true} : vector<4x1xf32> -> vector<4x1xf32>
    %359 = vector.broadcast %358 : vector<4x1xf32> to vector<4x8xf32>
    %360 = arith.mulf %357, %359 : vector<4x8xf32>
    %361 = vector.extract_strided_slice %272 {offsets = [4, 8], sizes = [4, 8], strides = [1, 1]} : vector<8x32xf32> to vector<4x8xf32>
    %362 = vector.extract_strided_slice %273 {offsets = [4, 8], sizes = [4, 8], strides = [1, 1]} : vector<8x32xf32> to vector<4x8xf32>
    %363 = vector.extract_strided_slice %274 {offsets = [4, 8], sizes = [4, 8], strides = [1, 1]} : vector<8x32xf32> to vector<4x8xf32>
    "tpu.trace_start"() <{level = 10 : i32, message = "qd,kd->qk"}> : () -> ()
    %cst_146 = arith.constant dense<0.000000e+00> : vector<4x4xf32>
    %364 = tpu.matmul %361, %362, %cst_146 {dimension_numbers = #tpu.dot_dimension_numbers<[1], [1], [0], [0], [0, 0, 1, 0], [], []>} : vector<4x8xf32>, vector<4x8xf32>, vector<4x4xf32> -> vector<4x4xf32>
    "tpu.trace_stop"() : () -> ()
    %cst_147 = arith.constant 0.353553385 : f32
    %365 = vector.broadcast %cst_147 : f32 to vector<4x4xf32>
    %366 = arith.mulf %364, %365 : vector<4x4xf32>
    %cst_148 = arith.constant dense<0xFF800000> : vector<4xf32>
    %367 = vector.multi_reduction <maximumf>, %366, %cst_148 [1] : vector<4x4xf32> to vector<4xf32>
    %368 = vector.shape_cast %367 : vector<4xf32> to vector<4x1xf32>
    %369 = vector.broadcast %368 : vector<4x1xf32> to vector<4x4xf32>
    %370 = arith.subf %366, %369 : vector<4x4xf32>
    %371 = math.exp %370 : vector<4x4xf32>
    %cst_149 = arith.constant dense<0.000000e+00> : vector<4xf32>
    %372 = vector.multi_reduction <add>, %371, %cst_149 [1] : vector<4x4xf32> to vector<4xf32>
    %373 = vector.shape_cast %372 : vector<4xf32> to vector<4x1xf32>
    %cst_150 = arith.constant dense<0.000000e+00> : vector<4x8xf32>
    %374 = tpu.matmul %371, %363, %cst_150 {dimension_numbers = #tpu.dot_dimension_numbers<[1], [0], [0], [1], [0, 0, 1, 1], [], []>} : vector<4x4xf32>, vector<4x8xf32>, vector<4x8xf32> -> vector<4x8xf32>
    %375 = tpu.reciprocal %373 {approx = true} : vector<4x1xf32> -> vector<4x1xf32>
    %376 = vector.broadcast %375 : vector<4x1xf32> to vector<4x8xf32>
    %377 = arith.mulf %374, %376 : vector<4x8xf32>
    %378 = vector.extract_strided_slice %272 {offsets = [4, 16], sizes = [4, 8], strides = [1, 1]} : vector<8x32xf32> to vector<4x8xf32>
    %379 = vector.extract_strided_slice %273 {offsets = [4, 16], sizes = [4, 8], strides = [1, 1]} : vector<8x32xf32> to vector<4x8xf32>
    %380 = vector.extract_strided_slice %274 {offsets = [4, 16], sizes = [4, 8], strides = [1, 1]} : vector<8x32xf32> to vector<4x8xf32>
    "tpu.trace_start"() <{level = 10 : i32, message = "qd,kd->qk"}> : () -> ()
    %cst_151 = arith.constant dense<0.000000e+00> : vector<4x4xf32>
    %381 = tpu.matmul %378, %379, %cst_151 {dimension_numbers = #tpu.dot_dimension_numbers<[1], [1], [0], [0], [0, 0, 1, 0], [], []>} : vector<4x8xf32>, vector<4x8xf32>, vector<4x4xf32> -> vector<4x4xf32>
    "tpu.trace_stop"() : () -> ()
    %cst_152 = arith.constant 0.353553385 : f32
    %382 = vector.broadcast %cst_152 : f32 to vector<4x4xf32>
    %383 = arith.mulf %381, %382 : vector<4x4xf32>
    %cst_153 = arith.constant dense<0xFF800000> : vector<4xf32>
    %384 = vector.multi_reduction <maximumf>, %383, %cst_153 [1] : vector<4x4xf32> to vector<4xf32>
    %385 = vector.shape_cast %384 : vector<4xf32> to vector<4x1xf32>
    %386 = vector.broadcast %385 : vector<4x1xf32> to vector<4x4xf32>
    %387 = arith.subf %383, %386 : vector<4x4xf32>
    %388 = math.exp %387 : vector<4x4xf32>
    %cst_154 = arith.constant dense<0.000000e+00> : vector<4xf32>
    %389 = vector.multi_reduction <add>, %388, %cst_154 [1] : vector<4x4xf32> to vector<4xf32>
    %390 = vector.shape_cast %389 : vector<4xf32> to vector<4x1xf32>
    %cst_155 = arith.constant dense<0.000000e+00> : vector<4x8xf32>
    %391 = tpu.matmul %388, %380, %cst_155 {dimension_numbers = #tpu.dot_dimension_numbers<[1], [0], [0], [1], [0, 0, 1, 1], [], []>} : vector<4x4xf32>, vector<4x8xf32>, vector<4x8xf32> -> vector<4x8xf32>
    %392 = tpu.reciprocal %390 {approx = true} : vector<4x1xf32> -> vector<4x1xf32>
    %393 = vector.broadcast %392 : vector<4x1xf32> to vector<4x8xf32>
    %394 = arith.mulf %391, %393 : vector<4x8xf32>
    %395 = vector.extract_strided_slice %272 {offsets = [4, 24], sizes = [4, 8], strides = [1, 1]} : vector<8x32xf32> to vector<4x8xf32>
    %396 = vector.extract_strided_slice %273 {offsets = [4, 24], sizes = [4, 8], strides = [1, 1]} : vector<8x32xf32> to vector<4x8xf32>
    %397 = vector.extract_strided_slice %274 {offsets = [4, 24], sizes = [4, 8], strides = [1, 1]} : vector<8x32xf32> to vector<4x8xf32>
    "tpu.trace_start"() <{level = 10 : i32, message = "qd,kd->qk"}> : () -> ()
    %cst_156 = arith.constant dense<0.000000e+00> : vector<4x4xf32>
    %398 = tpu.matmul %395, %396, %cst_156 {dimension_numbers = #tpu.dot_dimension_numbers<[1], [1], [0], [0], [0, 0, 1, 0], [], []>} : vector<4x8xf32>, vector<4x8xf32>, vector<4x4xf32> -> vector<4x4xf32>
    "tpu.trace_stop"() : () -> ()
    %cst_157 = arith.constant 0.353553385 : f32
    %399 = vector.broadcast %cst_157 : f32 to vector<4x4xf32>
    %400 = arith.mulf %398, %399 : vector<4x4xf32>
    %cst_158 = arith.constant dense<0xFF800000> : vector<4xf32>
    %401 = vector.multi_reduction <maximumf>, %400, %cst_158 [1] : vector<4x4xf32> to vector<4xf32>
    %402 = vector.shape_cast %401 : vector<4xf32> to vector<4x1xf32>
    %403 = vector.broadcast %402 : vector<4x1xf32> to vector<4x4xf32>
    %404 = arith.subf %400, %403 : vector<4x4xf32>
    %405 = math.exp %404 : vector<4x4xf32>
    %cst_159 = arith.constant dense<0.000000e+00> : vector<4xf32>
    %406 = vector.multi_reduction <add>, %405, %cst_159 [1] : vector<4x4xf32> to vector<4xf32>
    %407 = vector.shape_cast %406 : vector<4xf32> to vector<4x1xf32>
    %cst_160 = arith.constant dense<0.000000e+00> : vector<4x8xf32>
    %408 = tpu.matmul %405, %397, %cst_160 {dimension_numbers = #tpu.dot_dimension_numbers<[1], [0], [0], [1], [0, 0, 1, 1], [], []>} : vector<4x4xf32>, vector<4x8xf32>, vector<4x8xf32> -> vector<4x8xf32>
    %409 = tpu.reciprocal %407 {approx = true} : vector<4x1xf32> -> vector<4x1xf32>
    %410 = vector.broadcast %409 : vector<4x1xf32> to vector<4x8xf32>
    %411 = arith.mulf %408, %410 : vector<4x8xf32>
    %412 = tpu.concatenate %360, %377, %394, %411 in 1 : vector<4x8xf32>, vector<4x8xf32>, vector<4x8xf32>, vector<4x8xf32> -> vector<4x32xf32>
    %413 = tpu.concatenate %343, %412 in 0 : vector<4x32xf32>, vector<4x32xf32> -> vector<8x32xf32>
    %cst_161 = arith.constant dense<0.000000e+00> : vector<8x32xf32>
    %414 = tpu.matmul %413, %239, %cst_161 {dimension_numbers = #tpu.dot_dimension_numbers<[1], [0], [0], [1], [0, 0, 1, 1], [], []>} : vector<8x32xf32>, vector<32x32xf32>, vector<8x32xf32> -> vector<8x32xf32>
    %415 = arith.addf %234, %414 : vector<8x32xf32>
    %416 = vector.broadcast %240 : vector<1x32xf32> to vector<8x32xf32>
    %417 = arith.addf %415, %416 : vector<8x32xf32>
    %cst_162 = arith.constant dense<0.000000e+00> : vector<8xf32>
    %418 = vector.multi_reduction <add>, %417, %cst_162 [1] : vector<8x32xf32> to vector<8xf32>
    %419 = vector.shape_cast %418 : vector<8xf32> to vector<8x1xf32>
    %cst_163 = arith.constant 3.200000e+01 : f32
    %420 = vector.broadcast %cst_163 : f32 to vector<8x1xf32>
    %421 = arith.divf %419, %420 : vector<8x1xf32>
    %422 = vector.broadcast %421 : vector<8x1xf32> to vector<8x32xf32>
    %423 = arith.subf %417, %422 : vector<8x32xf32>
    %424 = arith.mulf %423, %423 : vector<8x32xf32>
    %cst_164 = arith.constant dense<0.000000e+00> : vector<8xf32>
    %425 = vector.multi_reduction <add>, %424, %cst_164 [1] : vector<8x32xf32> to vector<8xf32>
    %426 = vector.shape_cast %425 : vector<8xf32> to vector<8x1xf32>
    %cst_165 = arith.constant 3.200000e+01 : f32
    %427 = vector.broadcast %cst_165 : f32 to vector<8x1xf32>
    %428 = arith.divf %426, %427 : vector<8x1xf32>
    %429 = vector.broadcast %421 : vector<8x1xf32> to vector<8x32xf32>
    %430 = arith.subf %417, %429 : vector<8x32xf32>
    %cst_166 = arith.constant 9.99999974E-6 : f32
    %431 = vector.broadcast %cst_166 : f32 to vector<8x1xf32>
    %432 = arith.addf %428, %431 : vector<8x1xf32>
    %433 = math.rsqrt %432 : vector<8x1xf32>
    %434 = vector.broadcast %433 : vector<8x1xf32> to vector<8x32xf32>
    %435 = arith.mulf %430, %434 : vector<8x32xf32>
    %436 = vector.broadcast %241 : vector<1x32xf32> to vector<8x32xf32>
    %437 = arith.mulf %435, %436 : vector<8x32xf32>
    %438 = vector.broadcast %242 : vector<1x32xf32> to vector<8x32xf32>
    %439 = arith.addf %437, %438 : vector<8x32xf32>
    %cst_167 = arith.constant dense<0.000000e+00> : vector<8x64xf32>
    %440 = tpu.matmul %439, %243, %cst_167 {dimension_numbers = #tpu.dot_dimension_numbers<[1], [0], [0], [1], [0, 0, 1, 1], [], []>} : vector<8x32xf32>, vector<32x64xf32>, vector<8x64xf32> -> vector<8x64xf32>
    %441 = vector.broadcast %244 : vector<1x64xf32> to vector<8x64xf32>
    %442 = arith.addf %440, %441 : vector<8x64xf32>
    %443 = arith.mulf %442, %442 : vector<8x64xf32>
    %444 = arith.mulf %442, %443 : vector<8x64xf32>
    %cst_168 = arith.constant 4.471500e-02 : f32
    %445 = vector.broadcast %cst_168 : f32 to vector<8x64xf32>
    %446 = arith.mulf %445, %444 : vector<8x64xf32>
    %447 = arith.addf %442, %446 : vector<8x64xf32>
    %cst_169 = arith.constant 0.797884583 : f32
    %448 = vector.broadcast %cst_169 : f32 to vector<8x64xf32>
    %449 = arith.mulf %448, %447 : vector<8x64xf32>
    %450 = math.tanh %449 : vector<8x64xf32>
    %cst_170 = arith.constant 1.000000e+00 : f32
    %451 = vector.broadcast %cst_170 : f32 to vector<8x64xf32>
    %452 = arith.addf %451, %450 : vector<8x64xf32>
    %cst_171 = arith.constant 5.000000e-01 : f32
    %453 = vector.broadcast %cst_171 : f32 to vector<8x64xf32>
    %454 = arith.mulf %453, %452 : vector<8x64xf32>
    %455 = arith.mulf %442, %454 : vector<8x64xf32>
    %cst_172 = arith.constant dense<0.000000e+00> : vector<8x32xf32>
    %456 = tpu.matmul %455, %245, %cst_172 {dimension_numbers = #tpu.dot_dimension_numbers<[1], [0], [0], [1], [0, 0, 1, 1], [], []>} : vector<8x64xf32>, vector<64x32xf32>, vector<8x32xf32> -> vector<8x32xf32>
    %457 = arith.addf %417, %456 : vector<8x32xf32>
    %458 = vector.broadcast %246 : vector<1x32xf32> to vector<8x32xf32>
    %459 = arith.addf %457, %458 : vector<8x32xf32>
    %c0_173 = arith.constant 0 : index
    %c0_174 = arith.constant 0 : index
    %460 = vector.load %arg29[%c0_173, %c0_174] : memref<1x32xf32, #tpu.memory_space<vmem>>, vector<1x32xf32>
    %c0_175 = arith.constant 0 : index
    %c0_176 = arith.constant 0 : index
    %461 = vector.load %arg30[%c0_175, %c0_176] : memref<1x32xf32, #tpu.memory_space<vmem>>, vector<1x32xf32>
    %c0_177 = arith.constant 0 : index
    %c0_178 = arith.constant 0 : index
    %462 = vector.load %arg31[%c0_177, %c0_178] : memref<32x32xf32, #tpu.memory_space<vmem>>, vector<32x32xf32>
    %c0_179 = arith.constant 0 : index
    %c0_180 = arith.constant 0 : index
    %463 = vector.load %arg32[%c0_179, %c0_180] : memref<1x32xf32, #tpu.memory_space<vmem>>, vector<1x32xf32>
    %c0_181 = arith.constant 0 : index
    %c0_182 = arith.constant 0 : index
    %464 = vector.load %arg33[%c0_181, %c0_182] : memref<32x15xf32, #tpu.memory_space<vmem>>, vector<32x15xf32>
    %c0_183 = arith.constant 0 : index
    %c0_184 = arith.constant 0 : index
    %465 = vector.load %arg34[%c0_183, %c0_184] : memref<1x15xf32, #tpu.memory_space<vmem>>, vector<1x15xf32>
    %cst_185 = arith.constant dense<0.000000e+00> : vector<8xf32>
    %466 = vector.multi_reduction <add>, %459, %cst_185 [1] : vector<8x32xf32> to vector<8xf32>
    %467 = vector.shape_cast %466 : vector<8xf32> to vector<8x1xf32>
    %cst_186 = arith.constant 3.200000e+01 : f32
    %468 = vector.broadcast %cst_186 : f32 to vector<8x1xf32>
    %469 = arith.divf %467, %468 : vector<8x1xf32>
    %470 = vector.broadcast %469 : vector<8x1xf32> to vector<8x32xf32>
    %471 = arith.subf %459, %470 : vector<8x32xf32>
    %472 = arith.mulf %471, %471 : vector<8x32xf32>
    %cst_187 = arith.constant dense<0.000000e+00> : vector<8xf32>
    %473 = vector.multi_reduction <add>, %472, %cst_187 [1] : vector<8x32xf32> to vector<8xf32>
    %474 = vector.shape_cast %473 : vector<8xf32> to vector<8x1xf32>
    %cst_188 = arith.constant 3.200000e+01 : f32
    %475 = vector.broadcast %cst_188 : f32 to vector<8x1xf32>
    %476 = arith.divf %474, %475 : vector<8x1xf32>
    %477 = vector.broadcast %469 : vector<8x1xf32> to vector<8x32xf32>
    %478 = arith.subf %459, %477 : vector<8x32xf32>
    %cst_189 = arith.constant 9.99999974E-6 : f32
    %479 = vector.broadcast %cst_189 : f32 to vector<8x1xf32>
    %480 = arith.addf %476, %479 : vector<8x1xf32>
    %481 = math.rsqrt %480 : vector<8x1xf32>
    %482 = vector.broadcast %481 : vector<8x1xf32> to vector<8x32xf32>
    %483 = arith.mulf %478, %482 : vector<8x32xf32>
    %484 = vector.broadcast %460 : vector<1x32xf32> to vector<8x32xf32>
    %485 = arith.mulf %483, %484 : vector<8x32xf32>
    %486 = vector.broadcast %461 : vector<1x32xf32> to vector<8x32xf32>
    %487 = arith.addf %485, %486 : vector<8x32xf32>
    %cst_190 = arith.constant dense<0.000000e+00> : vector<2x32xf32>
    %488 = tpu.matmul %1, %487, %cst_190 {dimension_numbers = #tpu.dot_dimension_numbers<[1], [0], [0], [1], [0, 0, 1, 1], [], []>} : vector<2x8xf32>, vector<8x32xf32>, vector<2x32xf32> -> vector<2x32xf32>
    %cst_191 = arith.constant dense<0.000000e+00> : vector<2x32xf32>
    %489 = tpu.matmul %488, %462, %cst_191 {dimension_numbers = #tpu.dot_dimension_numbers<[1], [0], [0], [1], [0, 0, 1, 1], [], []>} : vector<2x32xf32>, vector<32x32xf32>, vector<2x32xf32> -> vector<2x32xf32>
    %490 = vector.broadcast %463 : vector<1x32xf32> to vector<2x32xf32>
    %491 = arith.addf %489, %490 : vector<2x32xf32>
    %cst_192 = arith.constant dense<0.000000e+00> : vector<2x15xf32>
    %492 = tpu.matmul %491, %464, %cst_192 {dimension_numbers = #tpu.dot_dimension_numbers<[1], [0], [0], [1], [0, 0, 1, 1], [], []>} : vector<2x32xf32>, vector<32x15xf32>, vector<2x15xf32> -> vector<2x15xf32>
    %493 = vector.broadcast %465 : vector<1x15xf32> to vector<2x15xf32>
    %494 = arith.addf %492, %493 : vector<2x15xf32>
    %cst_193 = arith.constant 0.000000e+00 : f32
    %495 = vector.broadcast %cst_193 : f32 to vector<2x81xf32>
    %496 = tpu.concatenate %491, %494, %495 in 1 : vector<2x32xf32>, vector<2x15xf32>, vector<2x81xf32> -> vector<2x128xf32>
    %c0_194 = arith.constant 0 : index
    %c0_195 = arith.constant 0 : index
    %497 = vector.load %arg35[%c0_194, %c0_195] : memref<2x128xf32, #tpu.memory_space<vmem>>, vector<2x128xf32>
    tpu.vector_store %arg35[%c0_194, %c0_195], %496 {strides = array<i32>} : memref<2x128xf32, #tpu.memory_space<vmem>>, vector<2x128xf32>,
    return
  }
}

</mosaic_0001>

<bundles_post_ra>
// kernel: _encode.1
= control target key start
LH: loop header
LB: loop body
LE: loop exit
PB: predicated region body
PF: predicated region fallthrough
CT: control target
= control target key end

     0   :  { %s4925_s3 = smov 2   ;;  %s4926_s10 = smov 4   ;;  %vm262_vm0 = vcmask 1043456   ;;  %vm293_vm1 = vcmask 261120   ;;  %vm4930_vm2 = vmmov 0   ;;  %vm404_vm3 = vcmask 64512   ;;  %s5556_s0 = inlined_call_operand.smem [shape: u32[36], index: -1, kind: input, shape index: {}] }
   0x1   :  { %s4982_s6 = sld [smem:[%s5556_s0 + %s4925_s3]]   ;;  %s4927_s14 = smov 3   ;;  %vm480_vm4 = vcmask 27648   ;;  %vm492_vm5 = vcmask 31744   ;;  %vm1084_vm6 = vcmask 130048   ;;  %vm1086_vm7 = vcmask 195584  }
   0x2   :  { %s4996_s9 = sld [smem:[%s5556_s0]]   ;;  %s4929_s18 = smov 7   ;;  %vm1970_vm8 = vcmask 523264   ;;  %vm4106_vm9 = vcmask 384000  }
   0x3   :  { %s4116_s13 = sld [smem:[%s5556_s0 + %s4926_s10]]   ;;  %s4932_s22 = smov 5  }
   0x4   :  { %s4115_s17 = sld [smem:[%s5556_s0 + %s4927_s14]]   ;;  %s4933_s26 = smov 6  }
   0x5   :  { %s4119_s21 = sld [smem:[%s5556_s0 + %s4929_s18]]   ;;  %s4934_s30 = smov 8  }
   0x6   :  { %s4117_s25 = sld [smem:[%s5556_s0 + %s4932_s22]]   ;;  %s4935_s4 = smov 64  }
   0x7   :  { %v165_v0 = vld [vmem:[%s4982_s6 + $0x80] sm:$0xff]  ;;  %v166_v1 = vld [vmem:[%s4982_s6 + $0x88] sm:$0xff]  ;;  %v167_v5 = vld [vmem:[%s4982_s6 + $0x90] sm:$0xff]  ;;  %s4118_s29 = sld [smem:[%s5556_s0 + %s4933_s26]]   ;;  %s4936_s5 = smov 96  }
   0x8   :  { %v149_v2 = vld [vmem:[%s4982_s6] sm:$0xff]  ;;  %v4694_v3 = vpack.c.bf16 %v166_v1, %v165_v0  ;;  %v150_v4 = vld [vmem:[%s4982_s6 + $0x8] sm:$0xff]  ;;  %v168_v6 = vld [vmem:[%s4982_s6 + $0x98] sm:$0xff]  ;;  %v4928_v1 = vmov 0.0|0.0   ;;  %s4120_s3 = sld [smem:[%s5556_s0 + %s4934_s30]]   ;;  %s4938_s7 = smov 120  }
   0x9   :  { %v4696_v7 = vpack.c.bf16 %v150_v4, %v149_v2  ;;  %v4698_v8 = vpack.c.bf16 %v168_v6, %v167_v5  ;;  %v151_v9 = vld [vmem:[%s4982_s6 + $0x10] sm:$0xff]  ;;  %v152_v10 = vld [vmem:[%s4982_s6 + $0x18] sm:$0xff]  ;;  %v169_v11 = vld [vmem:[%s4982_s6 + $0xa0] sm:$0xff]  ;;  %4726 = vmatprep.subr.bf16.mxu1 %v4928_v1  ;;  %v4931_v2 = vmov 0.0   ;;  %s4939_s8 = smov 56   ;;  %s4941_s10 = smov 112  }
   0xa   :  { %4695 = vmatprep.subr.bf16.mxu0 %v4694_v3  ;;  %v170_v12 = vld [vmem:[%s4982_s6 + $0xa8] sm:$0xff]  ;;  %v4700_v13 = vpack.c.bf16 %v152_v10, %v151_v9  ;;  %v153_v15 = vld [vmem:[%s4982_s6 + $0x20] sm:$0xff]  ;;  %v171_v17 = vld [vmem:[%s4982_s6 + $0xb0] sm:$0xff]  ;;  %4411 = vmatprep.mubr.msk.f32.mxu1 %vm4930_vm2, %v4931_v2  ;;  %s4942_s11 = smov 72   ;;  %s4943_s12 = smov 104  }
   0xb   :  { %4697 = vmatpush3.bf16.msra.mxu0 %v4696_v7  ;;  %v4702_v14 = vpack.c.bf16 %v170_v12, %v169_v11  ;;  %v154_v16 = vld [vmem:[%s4982_s6 + $0x28] sm:$0xff]  ;;  %v172_v18 = vld [vmem:[%s4982_s6 + $0xb8] sm:$0xff]  ;;  %v155_v21 = vld [vmem:[%s4982_s6 + $0x30] sm:$0xff]  ;;  %s4945_s14 = smov 48   ;;  %s4946_s15 = smov 9  }
   0xc   :  { %4699 = vmatprep.subr.bf16.mxu0 %v4698_v8  ;;  %v4704_v19 = vpack.c.bf16 %v154_v16, %v153_v15  ;;  %v4706_v20 = vpack.c.bf16 %v172_v18, %v171_v17  ;;  %v156_v22 = vld [vmem:[%s4982_s6 + $0x38] sm:$0xff]  ;;  %v173_v23 = vld [vmem:[%s4982_s6 + $0xc0] sm:$0xff]  ;;  %v174_v24 = vld [vmem:[%s4982_s6 + $0xc8] sm:$0xff]  ;;  %s4121_s18 = sld [smem:[%s5556_s0 + %s4946_s15]]   ;;  %s4947_s19 = smov 16  }
   0xd   :  { %v147_v25 = vld [vmem:[%s4996_s9 + $0x8] sm:$0xff]  ;;  %v4708_v26 = vpack.c.bf16 %v156_v22, %v155_v21  ;;  %v4710_v27 = vpack.c.bf16 %v174_v24, %v173_v23  ;;  %v157_v28 = vld [vmem:[%s4982_s6 + $0x40] sm:$0xff]  ;;  %v175_v30 = vld [vmem:[%s4982_s6 + $0xd0] sm:$0xff]  ;;  %s4948_s20 = smov 24   ;;  %s4952_s15 = smov 12  }
   0xe   :  { %253 = vmatprep.mubr.f32.mxu0 %v147_v25  ;;  %v158_v29 = vld [vmem:[%s4982_s6 + $0x48] sm:$0xff]  ;;  %v176_v31 = vld [vmem:[%s4982_s6 + $0xd8] sm:$0xff]  ;;  %v159_v34 = vld [vmem:[%s4982_s6 + $0x50] sm:$0xff]  ;;  %s4128_s2 = sld [smem:[%s5556_s0 + %s4947_s19]]   ;;  %s4963_s22 = smov 27  }
   0xf   :  { %4701 = vmatpush3.bf16.msra.mxu0 %v4700_v13  ;;  %v4712_v32 = vpack.c.bf16 %v158_v29, %v157_v28  ;;  %v4714_v33 = vpack.c.bf16 %v176_v31, %v175_v30  ;;  %v160_v35 = vld [vmem:[%s4982_s6 + $0x58] sm:$0xff]  ;;  %v177_v36 = vld [vmem:[%s4982_s6 + $0xe0] sm:$0xff]  ;;  %v178_v37 = vld [vmem:[%s4982_s6 + $0xe8] sm:$0xff] }
  0x10   :  { %4703 = vmatprep.subr.bf16.mxu0 %v4702_v14  ;;  %v4716_v38 = vpack.c.bf16 %v160_v35, %v159_v34  ;;  %v4718_v39 = vpack.c.bf16 %v178_v37, %v177_v36  ;;  %v161_v40 = vld [vmem:[%s4982_s6 + $0x60] sm:$0xff]  ;;  %v162_v41 = vld [vmem:[%s4982_s6 + $0x68] sm:$0xff]  ;;  %v179_v42 = vld [vmem:[%s4982_s6 + $0xf0] sm:$0xff] }
  0x11   :  { %v180_v43 = vld [vmem:[%s4982_s6 + $0xf8] sm:$0xff]  ;;  %v4720_v44 = vpack.c.bf16 %v162_v41, %v161_v40  ;;  %v163_v46 = vld [vmem:[%s4982_s6 + $0x70] sm:$0xff]  ;;  %v146_v49 = vld [vmem:[%s4996_s9] sm:$0xff]  ;;  %s4940_s9 = smov 80  }
  0x12   :  { %v4722_v45 = vpack.c.bf16 %v180_v43, %v179_v42  ;;  %v164_v47 = vld [vmem:[%s4982_s6 + $0x78] sm:$0xff]  ;;  %v182_v50 = vld [vmem:[%s4116_s13] sm:$0xf]  ;;  %v268_v4 = vld [vmem:[%s4119_s21 + $0x8] sm:$0xff]  ;;  %s4937_s6 = smov 88   ;;  %s4944_s13 = smov 40  }
  0x13   :  { %4705 = vmatpush3.bf16.msra.mxu0 %v4704_v19  ;;  %v4724_v48 = vpack.c.bf16 %v164_v47, %v163_v46  ;;  %v260_v51 = vrot.slane %v182_v50, 4  ;;  %v4148_v53 = vld [vmem:[%s4115_s17] ss:$0 sm:$0xff]  ;;  %v269_v5 = vld [vmem:[%s4119_s21 + $0x10] sm:$0xff]  ;;  %v270_v7 = vld [vmem:[%s4119_s21 + $0x18] sm:$0xff] }
  0x14   :  { %4707 = vmatprep.subr.bf16.mxu0 %v4706_v20  ;;  %v267_v3 = vld [vmem:[%s4119_s21] sm:$0xff]  ;;  %v4730_v8 = vpack.c.bf16 %v270_v7, %v269_v5  ;;  %s4949_s21 = smov 10  }
  0x15   :  { %v263_v56 = vsel %vm262_vm0, %v182_v50, %v260_v51  ;;  %v4727_v6 = vpack.c.bf16 %v268_v4, %v267_v3  ;;  %v4149_v13 = vld [vmem:[%s4117_s25] ss:$0 sm:$0xff]  ;;  %s4122_s24 = sld [smem:[%s5556_s0 + %s4949_s21]]   ;;  %s4950_s25 = smov 13  }
  0x16   :  { %v4150_v15 = vld [vmem:[%s4118_s29] ss:$0 sm:$0xff]  ;;  %s4125_s28 = sld [smem:[%s5556_s0 + %s4950_s25]]   ;;  %s4951_s29 = smov 11  }
  0x17   :  { %4709 = vmatpush3.bf16.msra.mxu0 %v4708_v26  ;;  %4728 = vmatpush3.bf16.msra.mxu1 %v4727_v6  ;;  %v4151_v18 = vld [vmem:[%s4120_s3] ss:$0 sm:$0xff]  ;;  %s4123_s3 = sld [smem:[%s5556_s0 + %s4951_s29]]   ;;  %s4953_s21 = smov 15  }
  0x18   :  { %4711 = vmatprep.subr.bf16.mxu0 %v4710_v27  ;;  %4729 = vmatprep.subr.bf16.mxu1 %v4928_v1  ;;  %s4954_s25 = smov 14   ;;  %s4965_s29 = smov 28  }
  0x1b   :  { %4713 = vmatpush3.bf16.msra.mxu0 %v4712_v32  ;;  %4731 = vmatpush3.bf16.msra.mxu1 %v4730_v8 }
  0x1c   :  { %4715 = vmatprep.subr.bf16.mxu0 %v4714_v33  ;;  %4414 = vmatprep.subr.mxu1 %v4931_v2 }
  0x1f   :  { %4717 = vmatpush3.bf16.msra.mxu0 %v4716_v38 }
  0x20   :  { %4719 = vmatprep.subr.bf16.mxu0 %v4718_v39 }
  0x23   :  { %4721 = vmatpush3.bf16.msra.mxu0 %v4720_v44 }
  0x24   :  { %4723 = vmatprep.subr.bf16.mxu0 %v4722_v45 }
  0x27   :  { %4725 = vmatpush3.bf16.msra.mxu0 %v4724_v48 }
  0x28   :  { %4444 = vmatprep.subr.mxu0 %v4931_v2 }
  0x2a   :  { %254 = vmatmul.mubr.f32.vlgmr.msra.gmra.mrb[0].mxu0 %v146_v49 }
  0x2b   :  { %4446 = vmatprep.mubr.msk.f32.mxu0 %vm4930_vm2, %v4931_v2 }
  0xfd   :  { %v4276_v52 = vpop.f32.mrb[0].mxu0 }
  0xfe   :  { %v4277_v54 = vpop.f32.mrb[1].mxu0 }
  0xff   :  { %v4278_v55 = vadd.f32 %v4277_v54, %v4276_v52 }
 0x101   :  { %v256_v57 = vadd.f32 %v4278_v55, %v4148_v53 }
 0x103   :  { %v5030_v58 = vadd.f32 %v263_v56, %v256_v57 }
 0x105   :  { %v294_v59 = vsel %vm293_vm1, %v5030_v58, 0.0 }
 0x106   :  { %295 = vadd.xlane.f32.xlu0 %v294_v59 }
 0x193   :  { %v296_v60 = vpop.xlane.xlu0 %295 }
 0x194   :  { %v298_v61 = vmul.f32 0.03125, %v296_v60 }
 0x196   :  { %v299_v62 = vsub.f32 %v5030_v58, %v298_v61 }
 0x198   :  { %v300_v63 = vmul.f32 %v299_v62, %v299_v62 }
 0x19a   :  { %v301_v0 = vsel %vm293_vm1, %v300_v63, 0.0 }
 0x19b   :  { %302 = vadd.xlane.f32.xlu0 %v301_v0 }
 0x228   :  { %v303_v9 = vpop.xlane.xlu0 %302 }
 0x229   :  { %v304_v10 = vmul.f32 0.03125, %v303_v9 }
 0x22b   :  { %v305_v11 = vadd.f32 1e-05, %v304_v10 }
 0x22d   :  { %4847 = vrsqrt.f32 %v305_v11 }
 0x237   :  { %v4848_v12 = vpop.eup %4847 }
 0x238   :  { %v307_v14 = vmul.f32 %v4848_v12, %v299_v62 }
 0x23a   :  { %v314_v16 = vmul.f32 %v4149_v13, %v307_v14 }
 0x23c   :  { %v321_v17 = vadd.f32 %v4150_v15, %v314_v16 }
 0x23e   :  { %4412 = vmatmul.mubr.msk.f32.vlgmr.msra.gmra.mrb[0].mxu1 %vm293_vm1, %v321_v17 }
 0x23f   :  { %4416 = vmatprep.mubr.msk.f32.mxu1 %vm4930_vm2, %v4931_v2 }
 0x311   :  { %v397_v19 = vpop.f32.mrb[0].mxu1 }
 0x312   :  { %v5060_v20 = vadd.f32 %v4151_v18, %v397_v19  ;;  %v4413_v21 = vpop.f32.mrb[1].mxu1 }
 0x314   :  { %490 = vrot.lane.b32.xlu0 %v5060_v20, %s4935_s4  ;;  %402 = vrot.lane.b32.xlu1 %v5060_v20, %s4936_s5  ;;  %v5088_v28 = vrot.slane %v5060_v20, 4 }
 0x318   :  { %572 = vrot.lane.b32.xlu0 %v5060_v20, %s4937_s6 }
 0x31c   :  { %570 = vrot.lane.b32.xlu0 %v5060_v20, %s4938_s7 }
 0x386   :  { %v403_v22 = vpop.permute.xlu1 %402  ;;  %v491_v23 = vpop.permute.xlu0 %490 }
 0x387   :  { %4415 = vmatpush3.xpose.msk.msra.mxu1 %vm404_vm3, %v403_v22 }
 0x388   :  { %4419 = vmatprep.subr.mxu1 %v4931_v2 }
 0x38a   :  { %4417 = vmatmul.mubr.msk.f32.vlgmr.msra.gmra.mrb[2].mxu1 %vm404_vm3, %v5060_v20  ;;  %v573_v35 = vpop.permute.xlu0 %572 }
 0x38b   :  { %4420 = vmatpush3.msk.msra.mxu1 %vm262_vm0, %v491_v23  ;;  %4421 = vmatprep.mubr.msk.f32.mxu1 %vm4930_vm2, %v4931_v2 }
 0x38c   :  { %4424 = vmatprep.subr.mxu1 %v4931_v2 }
 0x38e   :  { %v571_v38 = vpop.permute.xlu0 %570 }
 0x45d   :  { %v475_v24 = vpop.f32.mrb[2].mxu1 }
 0x45e   :  { %v479_v25 = vmul.f32 0.35355338, %v475_v24  ;;  %v4418_v26 = vpop.f32.mrb[3].mxu1 }
 0x460   :  { %v481_v27 = vsel %vm480_vm4, %v479_v25, -inf }
 0x461   :  { %482 = vmax.xlane.f32.xlu1 %v481_v27 }
 0x472   :  { %658 = vrot.lane.b32.xlu1 %v5060_v20, %s4939_s8 }
 0x476   :  { %739 = vrot.lane.b32.xlu1 %v5060_v20, %s4940_s9 }
 0x47a   :  { %737 = vrot.lane.b32.xlu1 %v5060_v20, %s4941_s10 }
 0x47e   :  { %906 = vrot.lane.b32.xlu1 %v5060_v20, %s4942_s11 }
 0x482   :  { %1089 = vrot.lane.b32.xlu1 %v5088_v28, %s4936_s5 }
 0x486   :  { %1256 = vrot.lane.b32.xlu1 %v5088_v28, %s4937_s6 }
 0x48a   :  { %1254 = vrot.lane.b32.xlu1 %v5088_v28, %s4938_s7 }
 0x48e   :  { %1423 = vrot.lane.b32.xlu1 %v5088_v28, %s4940_s9 }
 0x492   :  { %1421 = vrot.lane.b32.xlu1 %v5088_v28, %s4941_s10 }
 0x496   :  { %1590 = vrot.lane.b32.xlu1 %v5088_v28, %s4942_s11 }
 0x4ee   :  { %v483_v29 = vpop.xlane.xlu1 %482 }
 0x4ef   :  { %v484_v30 = vsub.f32 %v479_v25, %v483_v29 }
 0x4f1   :  { %v485_v31 = vmul.f32 1.442695, %v484_v30 }
 0x4f2   :  { %v659_v32 = vpop.permute.xlu1 %658 }
 0x4f3   :  { %4849 = vpow2.f32 %v485_v31 }
 0x4f6   :  { %v740_v33 = vpop.permute.xlu1 %739 }
 0x4fa   :  { %v738_v34 = vpop.permute.xlu1 %737 }
 0x4fd   :  { %v5102_v36 = vpop.eup %4849 }
 0x4fe   :  { %4422 = vmatmul.mubr.msk.f32.vlgmr.msra.gmra.mrb[4].mxu1 %vm492_vm5, %v5102_v36  ;;  %v907_v37 = vpop.permute.xlu1 %906 }
 0x4ff   :  { %4425 = vmatpush3.xpose.msk.msra.mxu1 %vm404_vm3, %v573_v35  ;;  %4445 = vmatpush3.xpose.msk.msra.mxu0 %vm404_vm3, %v907_v37 }
 0x500   :  { %4426 = vmatprep.mubr.msk.f32.mxu1 %vm4930_vm2, %v4931_v2  ;;  %4429 = vmatprep.subr.mxu1 %v4931_v2 }
 0x501   :  { %4454 = vmatprep.subr.mxu0 %v4931_v2 }
 0x502   :  { %4427 = vmatmul.mubr.msk.f32.vlgmr.msra.gmra.mrb[6].mxu1 %vm404_vm3, %v571_v38  ;;  %v1090_v45 = vpop.permute.xlu1 %1089 }
 0x503   :  { %4430 = vmatpush3.msk.msra.mxu1 %vm262_vm0, %v659_v32  ;;  %4431 = vmatprep.mubr.msk.f32.mxu1 %vm4930_vm2, %v4931_v2 }
 0x504   :  { %4434 = vmatprep.subr.mxu1 %v4931_v2 }
 0x506   :  { %v1257_v46 = vpop.permute.xlu1 %1256 }
 0x50a   :  { %v1255_v47 = vpop.permute.xlu1 %1254 }
 0x50e   :  { %v1424_v52 = vpop.permute.xlu1 %1423 }
 0x512   :  { %v1422_v53 = vpop.permute.xlu1 %1421 }
 0x516   :  { %v1591_v55 = vpop.permute.xlu1 %1590 }
 0x5d1   :  { %v5117_v39 = vpop.f32.mrb[4].mxu1 }
 0x5d2   :  { %v4423_v40 = vpop.f32.mrb[5].mxu1 }
 0x5d5   :  { %v644_v41 = vpop.f32.mrb[6].mxu1 }
 0x5d6   :  { %v648_v42 = vmul.f32 0.35355338, %v644_v41  ;;  %v4428_v43 = vpop.f32.mrb[7].mxu1 }
 0x5d8   :  { %v649_v44 = vsel %vm480_vm4, %v648_v42, -inf }
 0x5d9   :  { %650 = vmax.xlane.f32.xlu0 %v649_v44 }
 0x5ef   :  { %904 = vrot.lane.b32.xlu0 %v5060_v20, %s4943_s12 }
 0x5f3   :  { %1588 = vrot.lane.b32.xlu0 %v5088_v28, %s4943_s12 }
 0x666   :  { %v651_v48 = vpop.xlane.xlu0 %650 }
 0x667   :  { %v652_v49 = vsub.f32 %v648_v42, %v651_v48 }
 0x669   :  { %v653_v50 = vmul.f32 1.442695, %v652_v49 }
 0x66a   :  { %v905_v51 = vpop.permute.xlu0 %904 }
 0x66b   :  { %4851 = vpow2.f32 %v653_v50  ;;  %4447 = vmatmul.mubr.msk.f32.vlgmr.msra.gmra.mrb[2].mxu0 %vm404_vm3, %v905_v51 }
 0x66c   :  { %4455 = vmatpush3.xpose.msk.msra.mxu0 %vm404_vm3, %v1090_v45  ;;  %4456 = vmatprep.mubr.msk.f32.mxu0 %vm4930_vm2, %v4931_v2 }
 0x66d   :  { %4464 = vmatprep.subr.mxu0 %v4931_v2 }
 0x66e   :  { %v1589_v56 = vpop.permute.xlu0 %1588 }
 0x66f   :  { %4457 = vmatmul.mubr.msk.f32.vlgmr.msra.gmra.mrb[4].mxu0 %vm404_vm3, %v5088_v28 }
 0x670   :  { %4465 = vmatpush3.xpose.msk.msra.mxu0 %vm404_vm3, %v1257_v46  ;;  %4466 = vmatprep.mubr.msk.f32.mxu0 %vm4930_vm2, %v4931_v2 }
 0x671   :  { %4474 = vmatprep.subr.mxu0 %v4931_v2 }
 0x673   :  { %4467 = vmatmul.mubr.msk.f32.vlgmr.msra.gmra.mrb[6].mxu0 %vm404_vm3, %v1255_v47  ;;  %v487_v47 = vsel %vm480_vm4, %v5102_v36, 0.0 }
 0x674   :  { %4475 = vmatpush3.xpose.msk.msra.mxu0 %vm404_vm3, %v1424_v52  ;;  %4476 = vmatprep.mubr.msk.f32.mxu0 %vm4930_vm2, %v4931_v2 }
 0x675   :  { %v5139_v54 = vpop.eup %4851  ;;  %4484 = vmatprep.subr.mxu0 %v4931_v2 }
 0x676   :  { %4432 = vmatmul.mubr.msk.f32.vlgmr.msra.gmra.mrb[8].mxu1 %vm492_vm5, %v5139_v54  ;;  %v655_v43 = vsel %vm480_vm4, %v5139_v54, 0.0 }
 0x677   :  { %4435 = vmatpush3.xpose.msk.msra.mxu1 %vm404_vm3, %v740_v33  ;;  %4477 = vmatmul.mubr.msk.f32.vlgmr.msra.gmra.mrb[8].mxu0 %vm404_vm3, %v1422_v53 }
 0x678   :  { %4485 = vmatpush3.xpose.msk.msra.mxu0 %vm404_vm3, %v1591_v55  ;;  %4436 = vmatprep.mubr.msk.f32.mxu1 %vm4930_vm2, %v4931_v2 }
 0x679   :  { %4486 = vmatprep.mubr.msk.f32.mxu0 %vm4930_vm2, %v4931_v2  ;;  %4439 = vmatprep.subr.mxu1 %v4931_v2 }
 0x67a   :  { %4437 = vmatmul.mubr.msk.f32.vlgmr.msra.gmra.mrb[10].mxu1 %vm404_vm3, %v738_v34  ;;  %4732 = vmatprep.subr.bf16.mxu0 %v4928_v1 }
 0x67b   :  { %4487 = vmatmul.mubr.msk.f32.vlgmr.msra.gmra.mrb[10].mxu0 %vm404_vm3, %v1589_v56  ;;  %4441 = vmatprep.mubr.msk.f32.mxu1 %vm4930_vm2, %v4931_v2 }
 0x67c   :  { %4502 = vmatprep.mubr.msk.f32.mxu0 %vm4930_vm2, %v4931_v2 }
 0x73e   :  { %v978_v57 = vpop.f32.mrb[2].mxu0 }
 0x73f   :  { %v982_v59 = vmul.f32 0.35355338, %v978_v57  ;;  %v4448_v60 = vpop.f32.mrb[3].mxu0 }
 0x741   :  { %v983_v61 = vsel %vm480_vm4, %v982_v59, -inf }
 0x742   :  { %984 = vmax.xlane.f32.xlu0 %v983_v61  ;;  %v1161_v62 = vpop.f32.mrb[4].mxu0 }
 0x743   :  { %v5160_v63 = vmul.f32 0.35355338, %v1161_v62  ;;  %v4458_v0 = vpop.f32.mrb[5].mxu0 }
 0x745   :  { %v1166_v3 = vsel %vm480_vm4, %v5160_v63, -inf }
 0x746   :  { %1167 = vmax.xlane.f32.xlu0 %v1166_v3  ;;  %v1328_v4 = vpop.f32.mrb[6].mxu0 }
 0x747   :  { %v1332_v5 = vmul.f32 0.35355338, %v1328_v4  ;;  %v4468_v6 = vpop.f32.mrb[7].mxu0 }
 0x749   :  { %v5164_v7 = vpop.f32.mrb[8].mxu1  ;;  %v1333_v8 = vsel %vm480_vm4, %v1332_v5, -inf }
 0x74a   :  { %1334 = vmax.xlane.f32.xlu1 %v1333_v8  ;;  %v4433_v9 = vpop.f32.mrb[9].mxu1  ;;  %v1495_v10 = vpop.f32.mrb[8].mxu0 }
 0x74b   :  { %v1499_v11 = vmul.f32 0.35355338, %v1495_v10  ;;  %v4478_v12 = vpop.f32.mrb[9].mxu0 }
 0x74c   :  { %v272_v12 = vld [vmem:[%s4121_s18] sm:$0xff] }
 0x74d   :  { %v811_v13 = vpop.f32.mrb[10].mxu1  ;;  %v1500_v14 = vsel %vm480_vm4, %v1499_v11, -inf }
 0x74e   :  { %1501 = vmax.xlane.f32.xlu0 %v1500_v14  ;;  %v4438_v15 = vpop.f32.mrb[11].mxu1  ;;  %v1662_v16 = vpop.f32.mrb[10].mxu0  ;;  %v815_v21 = vmul.f32 0.35355338, %v811_v13  ;;  %v273_v13 = vld [vmem:[%s4121_s18 + $0x8] sm:$0xff] }
 0x74f   :  { %v1666_v17 = vmul.f32 0.35355338, %v1662_v16  ;;  %v4488_v18 = vpop.f32.mrb[11].mxu0 }
 0x750   :  { %v816_v22 = vsel %vm480_vm4, %v815_v21, -inf  ;;  %v275_v18 = vld [vmem:[%s4121_s18 + $0x18] sm:$0xff] }
 0x751   :  { %v1667_v19 = vsel %vm480_vm4, %v1666_v17, -inf }
 0x752   :  { %1668 = vmax.xlane.f32.xlu1 %v1667_v19 }
 0x763   :  { %992 = vrot.lane.b32.xlu1 %v5060_v20, %s4944_s13 }
 0x764   :  { %825 = vrot.lane.b32.xlu0 %v5060_v20, %s4945_s14 }
 0x768   :  { %1342 = vrot.lane.b32.xlu0 %v5088_v28, %s4939_s8 }
 0x76c   :  { %1676 = vrot.lane.b32.xlu0 %v5088_v28, %s4944_s13 }
 0x787   :  { %817 = vmax.xlane.f32.xlu1 %v816_v22 }
 0x798   :  { %1175 = vrot.lane.b32.xlu1 %v5088_v28, %s4935_s4 }
 0x79c   :  { %1509 = vrot.lane.b32.xlu1 %v5088_v28, %s4945_s14 }
 0x7cf   :  { %v985_v23 = vpop.xlane.xlu0 %984 }
 0x7d0   :  { %v986_v30 = vsub.f32 %v982_v59, %v985_v23 }
 0x7d2   :  { %v987_v35 = vmul.f32 1.442695, %v986_v30 }
 0x7d3   :  { %v1168_v24 = vpop.xlane.xlu0 %1167 }
 0x7d4   :  { %v1169_v49 = vsub.f32 %v5160_v63, %v1168_v24 }
 0x7d6   :  { %v1170_v52 = vmul.f32 1.442695, %v1169_v49 }
 0x7d7   :  { %v1335_v25 = vpop.xlane.xlu1 %1334 }
 0x7d8   :  { %v1336_v20 = vsub.f32 %v1332_v5, %v1335_v25 }
 0x7da   :  { %v1337_v26 = vmul.f32 1.442695, %v1336_v20 }
 0x7db   :  { %v1502_v27 = vpop.xlane.xlu0 %1501 }
 0x7dc   :  { %4853 = vpow2.f32 %v1337_v26  ;;  %v1503_v29 = vsub.f32 %v1499_v11, %v1502_v27 }
 0x7de   :  { %v1504_v31 = vmul.f32 1.442695, %v1503_v29 }
 0x7df   :  { %v1669_v32 = vpop.xlane.xlu1 %1668  ;;  %v826_v33 = vpop.permute.xlu0 %825 }
 0x7e0   :  { %4855 = vpow2.f32 %v1504_v31  ;;  %v1670_v34 = vsub.f32 %v1666_v17, %v1669_v32  ;;  %4440 = vmatpush3.msk.msra.mxu1 %vm262_vm0, %v826_v33  ;;  %v274_v17 = vld [vmem:[%s4121_s18 + $0x10] sm:$0xff]  ;;  %s4124_s18 = sld [smem:[%s5556_s0 + %s4952_s15]]  }
 0x7e1   :  { %4449 = vmatprep.subr.mxu1 %v4931_v2  ;;  %v4736_v22 = vpack.c.bf16 %v275_v18, %v274_v17 }
 0x7e2   :  { %v1671_v28 = vmul.f32 1.442695, %v1670_v34 }
 0x7e3   :  { %v993_v48 = vpop.permute.xlu1 %992  ;;  %v1343_v59 = vpop.permute.xlu0 %1342 }
 0x7e4   :  { %4857 = vpow2.f32 %v1671_v28 }
 0x7e5   :  { %4859 = vpow2.f32 %v987_v35 }
 0x7e6   :  { %v4854_v37 = vpop.eup %4853  ;;  %v4188_v17 = vld [vmem:[%s4124_s18] ss:$0 sm:$0xff]  ;;  %s4956_s18 = smov 17  }
 0x7e7   :  { %v1339_v38 = vsel %vm480_vm4, %v4854_v37, 0.0  ;;  %v1677_v61 = vpop.permute.xlu0 %1676  ;;  %s4129_s23 = sld [smem:[%s5556_s0 + %s4956_s18]]   ;;  %s4970_s18 = smov 33  }
 0x7e8   :  { %1340 = vadd.xlane.f32.xlu1 %v1339_v38 }
 0x7ea   :  { %v4856_v40 = vpop.eup %4855 }
 0x7eb   :  { %v1506_v41 = vsel %vm480_vm4, %v4856_v40, 0.0 }
 0x7ec   :  { %1507 = vadd.xlane.f32.xlu0 %v1506_v41 }
 0x7ee   :  { %v4858_v42 = vpop.eup %4857 }
 0x7ef   :  { %v1673_v44 = vsel %vm480_vm4, %v4858_v42, 0.0  ;;  %v4860_v45 = vpop.eup %4859 }
 0x7f0   :  { %656 = vadd.xlane.f32.xlu0 %v655_v43  ;;  %1674 = vadd.xlane.f32.xlu1 %v1673_v44  ;;  %v989_v46 = vsel %vm480_vm4, %v4860_v45, 0.0 }
 0x7f4   :  { %990 = vadd.xlane.f32.xlu1 %v989_v46 }
 0x7f8   :  { %488 = vadd.xlane.f32.xlu1 %v487_v47 }
 0x814   :  { %v818_v50 = vpop.xlane.xlu1 %817 }
 0x815   :  { %v819_v51 = vsub.f32 %v815_v21, %v818_v50 }
 0x817   :  { %v820_v53 = vmul.f32 1.442695, %v819_v51 }
 0x818   :  { %v1176_v36 = vpop.permute.xlu1 %1175 }
 0x819   :  { %4861 = vpow2.f32 %v820_v53 }
 0x81a   :  { %4863 = vpow2.f32 %v1170_v52 }
 0x81c   :  { %v1510_v60 = vpop.permute.xlu1 %1509 }
 0x823   :  { %v4862_v54 = vpop.eup %4861 }
 0x824   :  { %4442 = vmatmul.mubr.msk.f32.vlgmr.msra.gmra.mrb[12].mxu1 %vm492_vm5, %v4862_v54  ;;  %v822_v55 = vsel %vm480_vm4, %v4862_v54, 0.0  ;;  %v4864_v56 = vpop.eup %4863 }
 0x825   :  { %4450 = vmatpush3.msk.msra.mxu1 %vm262_vm0, %v993_v48  ;;  %823 = vadd.xlane.f32.xlu0 %v822_v55  ;;  %v1172_v57 = vsel %vm480_vm4, %v4864_v56, 0.0 }
 0x826   :  { %4451 = vmatprep.mubr.msk.f32.mxu1 %vm4930_vm2, %v4931_v2  ;;  %4459 = vmatprep.subr.mxu1 %v4931_v2 }
 0x828   :  { %4452 = vmatmul.mubr.msk.f32.vlgmr.msra.gmra.mrb[14].mxu1 %vm492_vm5, %v4860_v45 }
 0x829   :  { %4460 = vmatpush3.msk.msra.mxu1 %vm262_vm0, %v1176_v36  ;;  %1173 = vadd.xlane.f32.xlu0 %v1172_v57 }
 0x82a   :  { %4461 = vmatprep.mubr.msk.f32.mxu1 %vm4930_vm2, %v4931_v2  ;;  %4469 = vmatprep.subr.mxu1 %v4931_v2 }
 0x82c   :  { %4462 = vmatmul.mubr.msk.f32.vlgmr.msra.gmra.mrb[16].mxu1 %vm492_vm5, %v4864_v56 }
 0x82d   :  { %4470 = vmatpush3.msk.msra.mxu1 %vm262_vm0, %v1343_v59  ;;  %4471 = vmatprep.mubr.msk.f32.mxu1 %vm4930_vm2, %v4931_v2 }
 0x82e   :  { %4479 = vmatprep.subr.mxu1 %v4931_v2 }
 0x830   :  { %4472 = vmatmul.mubr.msk.f32.vlgmr.msra.gmra.mrb[18].mxu1 %vm492_vm5, %v4854_v37 }
 0x831   :  { %4480 = vmatpush3.msk.msra.mxu1 %vm262_vm0, %v1510_v60  ;;  %4481 = vmatprep.mubr.msk.f32.mxu1 %vm4930_vm2, %v4931_v2 }
 0x832   :  { %4489 = vmatprep.subr.mxu1 %v4931_v2 }
 0x834   :  { %4482 = vmatmul.mubr.msk.f32.vlgmr.msra.gmra.mrb[20].mxu1 %vm492_vm5, %v4856_v40 }
 0x835   :  { %4490 = vmatpush3.msk.msra.mxu1 %vm262_vm0, %v1677_v61  ;;  %4491 = vmatprep.mubr.msk.f32.mxu1 %vm4930_vm2, %v4931_v2 }
 0x836   :  { %4738 = vmatprep.subr.bf16.mxu1 %v4928_v1 }
 0x838   :  { %4492 = vmatmul.mubr.msk.f32.vlgmr.msra.gmra.mrb[22].mxu1 %vm492_vm5, %v4858_v42 }
 0x839   :  { %4513 = vmatprep.mubr.msk.f32.mxu1 %vm4930_vm2, %v4931_v2 }
 0x875   :  { %v1341_v4 = vpop.xlane.xlu1 %1340 }
 0x879   :  { %v1508_v62 = vpop.xlane.xlu0 %1507 }
 0x87d   :  { %v657_v63 = vpop.xlane.xlu0 %656  ;;  %v1675_v9 = vpop.xlane.xlu1 %1674 }
 0x87e   :  { %4865 = vrcp.f32 %v657_v63 }
 0x87f   :  { %4867 = vrcp.f32 %v1341_v4 }
 0x880   :  { %4869 = vrcp.f32 %v1508_v62 }
 0x881   :  { %4871 = vrcp.f32 %v1675_v9  ;;  %v991_v16 = vpop.xlane.xlu1 %990  ;;  %v281_v9 = vld [vmem:[%s4125_s28 + $0x10] sm:$0xff] }
 0x885   :  { %v489_v38 = vpop.xlane.xlu1 %488 }
 0x888   :  { %v4866_v0 = vpop.eup %4865 }
 0x889   :  { %v736_v3 = vmul.f32 %v4866_v0, %v5164_v7  ;;  %v4733_v7 = vpack.c.bf16 %v273_v13, %v272_v12  ;;  %v4868_v19 = vpop.eup %4867 }
 0x88a   :  { %v4870_v25 = vpop.eup %4869 }
 0x88b   :  { %1072 = vrot.lane.b32.xlu1 %v736_v3, %s4934_s30  ;;  %4734 = vmatpush3.bf16.msra.mxu0 %v4733_v7  ;;  %v4872_v29 = vpop.eup %4871 }
 0x88c   :  { %4735 = vmatprep.subr.bf16.mxu0 %v4928_v1 }
 0x88f   :  { %4737 = vmatpush3.bf16.msra.mxu0 %v4736_v22 }
 0x890   :  { %4744 = vmatprep.subr.bf16.mxu0 %v4928_v1 }
 0x8b2   :  { %v824_v11 = vpop.xlane.xlu0 %823 }
 0x8b3   :  { %4873 = vrcp.f32 %v824_v11 }
 0x8b4   :  { %4875 = vrcp.f32 %v991_v16 }
 0x8b6   :  { %v1174_v37 = vpop.xlane.xlu0 %1173 }
 0x8b7   :  { %4877 = vrcp.f32 %v1174_v37 }
 0x8b8   :  { %4879 = vrcp.f32 %v489_v38 }
 0x8bd   :  { %v4874_v30 = vpop.eup %4873 }
 0x8be   :  { %v4876_v35 = vpop.eup %4875 }
 0x8c1   :  { %v4878_v41 = vpop.eup %4877 }
 0x8c2   :  { %v4880_v45 = vpop.eup %4879 }
 0x8c3   :  { %v569_v49 = vmul.f32 %v4880_v45, %v5117_v39  ;;  %v4186_v39 = vld [vmem:[%s4122_s24] ss:$0 sm:$0xff]  ;;  %s4127_s24 = sld [smem:[%s5556_s0 + %s4953_s21]]  }
 0x8c4   :  { %s4136_s21 = sld [smem:[%s5556_s0 + %s4948_s20]]  }
 0x8c9   :  { %v285_v22 = vld [vmem:[%s4127_s24 + $0x8] sm:$0xff] }
 0x8f7   :  { %v898_v5 = vpop.f32.mrb[12].mxu1 }
 0x8f8   :  { %v4443_v6 = vpop.f32.mrb[13].mxu1  ;;  %v903_v32 = vmul.f32 %v4874_v30, %v898_v5  ;;  %v290_v30 = vld [vmem:[%s4127_s24 + $0x30] sm:$0xff] }
 0x8f9   :  { %v280_v6 = vld [vmem:[%s4125_s28 + $0x8] sm:$0xff] }
 0x8fb   :  { %v1065_v8 = vpop.f32.mrb[14].mxu1 }
 0x8fc   :  { %v4453_v10 = vpop.f32.mrb[15].mxu1  ;;  %v1070_v28 = vmul.f32 %v4876_v35, %v1065_v8 }
 0x8fd   :  { %v1073_v40 = vpop.permute.xlu1 %1072  ;;  %v282_v10 = vld [vmem:[%s4125_s28 + $0x18] sm:$0xff] }
 0x8fe   :  { %v1083_v52 = vsel %vm404_vm3, %v569_v49, %v1073_v40  ;;  %v4742_v11 = vpack.c.bf16 %v282_v10, %v281_v9 }
 0x8ff   :  { %v1248_v14 = vpop.f32.mrb[16].mxu1 }
 0x900   :  { %v4463_v15 = vpop.f32.mrb[17].mxu1  ;;  %v1253_v44 = vmul.f32 %v4878_v41, %v1248_v14 }
 0x901   :  { %v4187_v15 = vld [vmem:[%s4123_s3] ss:$0 sm:$0xff]  ;;  %s4955_s3 = smov 19  }
 0x902   :  { %s4131_s17 = sld [smem:[%s5556_s0 + %s4955_s3]]   ;;  %s4969_s3 = smov 1  }
 0x903   :  { %v1415_v21 = vpop.f32.mrb[18].mxu1 }
 0x904   :  { %v1420_v23 = vmul.f32 %v4868_v19, %v1415_v21  ;;  %v4473_v24 = vpop.f32.mrb[19].mxu1  ;;  %v284_v21 = vld [vmem:[%s4127_s24] sm:$0xff] }
 0x905   :  { %v286_v24 = vld [vmem:[%s4127_s24 + $0x10] sm:$0xff] }
 0x906   :  { %1756 = vrot.lane.b32.xlu0 %v1420_v23, %s4934_s30  ;;  %v4745_v23 = vpack.c.bf16 %v285_v22, %v284_v21 }
 0x907   :  { %v1582_v20 = vpop.f32.mrb[20].mxu1 }
 0x908   :  { %v1587_v26 = vmul.f32 %v4870_v25, %v1582_v20  ;;  %v4483_v27 = vpop.f32.mrb[21].mxu1  ;;  %v287_v25 = vld [vmem:[%s4127_s24 + $0x18] sm:$0xff] }
 0x909   :  { %v4748_v20 = vpack.c.bf16 %v287_v25, %v286_v24  ;;  %v289_v27 = vld [vmem:[%s4127_s24 + $0x28] sm:$0xff] }
 0x90a   :  { %1760 = vrot.lane.b32.xlu1 %v1587_v26, %s4947_s19  ;;  %v288_v26 = vld [vmem:[%s4127_s24 + $0x20] sm:$0xff] }
 0x90b   :  { %v1749_v31 = vpop.f32.mrb[22].mxu1 }
 0x90c   :  { %v1754_v33 = vmul.f32 %v4872_v29, %v1749_v31  ;;  %v4493_v34 = vpop.f32.mrb[23].mxu1  ;;  %v4751_v29 = vpack.c.bf16 %v289_v27, %v288_v26  ;;  %v291_v31 = vld [vmem:[%s4127_s24 + $0x38] sm:$0xff]  ;;  %s4957_s24 = smov 18  }
 0x90d   :  { %s4130_s27 = sld [smem:[%s5556_s0 + %s4957_s24]]   ;;  %s4971_s24 = smov 32  }
 0x90e   :  { %1076 = vrot.lane.b32.xlu1 %v903_v32, %s4947_s19  ;;  %1764 = vrot.lane.b32.xlu0 %v1754_v33, %s4948_s20  ;;  %v4754_v32 = vpack.c.bf16 %v291_v31, %v290_v30  ;;  %s4144_s26 = sld [smem:[%s5556_s0 + %s4971_s24]]  }
 0x912   :  { %1080 = vrot.lane.b32.xlu0 %v1070_v28, %s4948_s20 }
 0x978   :  { %v1757_v42 = vpop.permute.xlu0 %1756 }
 0x979   :  { %v1767_v46 = vsel %vm404_vm3, %v1253_v44, %v1757_v42 }
 0x97c   :  { %v1761_v43 = vpop.permute.xlu1 %1760 }
 0x97d   :  { %v1768_v47 = vsel %vm1084_vm6, %v1767_v46, %v1761_v43 }
 0x980   :  { %v1765_v48 = vpop.permute.xlu0 %1764  ;;  %v1077_v50 = vpop.permute.xlu1 %1076 }
 0x981   :  { %v1769_v51 = vsel %vm1086_vm7, %v1768_v47, %v1765_v48  ;;  %v1085_v53 = vsel %vm1084_vm6, %v1083_v52, %v1077_v50  ;;  %v4192_v47 = vld [vmem:[%s4128_s2] ss:$0 sm:$0xff] }
 0x982   :  { %v1771_v54 = vrot.slane %v1769_v51, 4 }
 0x984   :  { %v1081_v55 = vpop.permute.xlu0 %1080 }
 0x985   :  { %v1087_v56 = vsel %vm1086_vm7, %v1085_v53, %v1081_v55 }
 0x986   :  { %v1773_v36 = vsel %vm262_vm0, %v1087_v56, %v1771_v54 }
 0x987   :  { %4503 = vmatmul.mubr.msk.f32.vlgmr.msra.gmra.mrb[12].mxu0 %vm293_vm1, %v1773_v36 }
 0x988   :  { %4532 = vmatprep.mubr.msk.f32.mxu0 %vm4930_vm2, %v4931_v2  ;;  %4746 = vmatpush3.bf16.msra.mxu0 %v4745_v23 }
 0x989   :  { %4747 = vmatprep.subr.bf16.mxu0 %v4928_v1 }
 0x98c   :  { %4749 = vmatpush3.bf16.msra.mxu0 %v4748_v20 }
 0x98d   :  { %4750 = vmatprep.subr.bf16.mxu0 %v4928_v1 }
 0x990   :  { %4752 = vmatpush3.bf16.msra.mxu0 %v4751_v29 }
 0x991   :  { %4753 = vmatprep.subr.bf16.mxu0 %v4928_v1 }
 0x994   :  { %4755 = vmatpush3.bf16.msra.mxu0 %v4754_v32 }
 0x995   :  { %4556 = vmatprep.subr.mxu0 %v4931_v2 }
 0xa5a   :  { %v1843_v57 = vpop.f32.mrb[12].mxu0 }
 0xa5b   :  { %v1847_v59 = vadd.f32 %v1843_v57, %v5030_v58  ;;  %v4504_v60 = vpop.f32.mrb[13].mxu0  ;;  %v279_v58 = vld [vmem:[%s4125_s28] sm:$0xff]  ;;  %s4126_s28 = sld [smem:[%s5556_s0 + %s4954_s25]]   ;;  %v2055_v57 = vld [vmem:[%s4131_s17 + $0x8] sm:$0xff] }
 0xa5c   :  { %v4739_v8 = vpack.c.bf16 %v280_v6, %v279_v58  ;;  %v2056_v60 = vld [vmem:[%s4131_s17 + $0x10] sm:$0xff]  ;;  %v4194_v6 = vld [vmem:[%s4130_s27] ss:$0 sm:$0xff]  ;;  %s4139_s25 = sld [smem:[%s5556_s0 + %s4963_s22]]   ;;  %s4972_s27 = smov 34  }
 0xa5d   :  { %v5250_v61 = vadd.f32 %v4186_v39, %v1847_v59  ;;  %v2054_v39 = vld [vmem:[%s4131_s17] sm:$0xff]  ;;  %s4146_s1 = sld [smem:[%s5556_s0 + %s4972_s27]]  }
 0xa5e   :  { %4740 = vmatpush3.bf16.msra.mxu1 %v4739_v8  ;;  %v4757_v59 = vpack.c.bf16 %v2055_v57, %v2054_v39 }
 0xa5f   :  { %v1855_v62 = vsel %vm293_vm1, %v5250_v61, 0.0  ;;  %4741 = vmatprep.subr.bf16.mxu1 %v4928_v1 }
 0xa60   :  { %1856 = vadd.xlane.f32.xlu1 %v1855_v62 }
 0xa61   :  { %v4189_v33 = vld [vmem:[%s4126_s28] ss:$0 sm:$0xff]  ;;  %s4958_s28 = smov 20  }
 0xa62   :  { %4743 = vmatpush3.bf16.msra.mxu1 %v4742_v11  ;;  %s4132_s2 = sld [smem:[%s5556_s0 + %s4958_s28]]  }
 0xa63   :  { %4756 = vmatprep.subr.bf16.mxu1 %v4928_v1 }
 0xa68   :  { %v4195_v10 = vld [vmem:[%s4132_s2] ss:$0 sm:$0xff]  ;;  %s4973_s2 = smov 35  }
 0xaed   :  { %v1857_v63 = vpop.xlane.xlu1 %1856 }
 0xaee   :  { %v1858_v0 = vmul.f32 0.03125, %v1857_v63 }
 0xaf0   :  { %v1859_v3 = vsub.f32 %v5250_v61, %v1858_v0 }
 0xaf2   :  { %v1860_v4 = vmul.f32 %v1859_v3, %v1859_v3 }
 0xaf4   :  { %v1861_v5 = vsel %vm293_vm1, %v1860_v4, 0.0 }
 0xaf5   :  { %1862 = vadd.xlane.f32.xlu0 %v1861_v5  ;;  %v4193_v5 = vld [vmem:[%s4129_s23] ss:$0 sm:$0xff]  ;;  %s4145_s23 = sld [smem:[%s5556_s0 + %s4970_s18]]  }
 0xb82   :  { %v1863_v12 = vpop.xlane.xlu0 %1862 }
 0xb83   :  { %v1864_v13 = vmul.f32 0.03125, %v1863_v12 }
 0xb85   :  { %v1865_v14 = vadd.f32 1e-05, %v1864_v13 }
 0xb87   :  { %4881 = vrsqrt.f32 %v1865_v14 }
 0xb91   :  { %v4882_v7 = vpop.eup %4881 }
 0xb92   :  { %v1867_v16 = vmul.f32 %v4882_v7, %v1859_v3 }
 0xb94   :  { %v1874_v18 = vmul.f32 %v4187_v15, %v1867_v16 }
 0xb96   :  { %v1881_v19 = vadd.f32 %v4188_v17, %v1874_v18 }
 0xb98   :  { %4514 = vmatmul.mubr.msk.f32.vlgmr.msra.gmra.mrb[24].mxu1 %vm293_vm1, %v1881_v19 }
 0xb99   :  { %4543 = vmatprep.mubr.msk.f32.mxu1 %vm4930_vm2, %v4931_v2  ;;  %4758 = vmatpush3.bf16.msra.mxu1 %v4757_v59 }
 0xb9a   :  { %4759 = vmatprep.subr.bf16.mxu1 %v4928_v1 }
 0xc6b   :  { %v1957_v34 = vpop.f32.mrb[24].mxu1 }
 0xc6c   :  { %v1958_v35 = vadd.f32 %v4189_v33, %v1957_v34  ;;  %v4515_v28 = vpop.f32.mrb[25].mxu1 }
 0xc6e   :  { %v1961_v37 = vmul.f32 %v1958_v35, %v1958_v35 }
 0xc70   :  { %v1962_v38 = vmul.f32 %v1961_v37, %v1958_v35 }
 0xc72   :  { %v1963_v40 = vmul.f32 0.044715, %v1962_v38 }
 0xc74   :  { %v1964_v41 = vadd.f32 %v1963_v40, %v1958_v35 }
 0xc76   :  { %v1965_v42 = vmul.f32 0.7978846, %v1964_v41 }
 0xc78   :  { %4883 = vtanh.f32 %v1965_v42 }
 0xc82   :  { %v4884_v43 = vpop.eup %4883 }
 0xc83   :  { %v1967_v44 = vadd.f32 1.0, %v4884_v43 }
 0xc85   :  { %v1968_v45 = vmul.f32 0.5, %v1967_v44 }
 0xc87   :  { %v1969_v46 = vmul.f32 %v1968_v45, %v1958_v35 }
 0xc89   :  { %4533 = vmatmul.mubr.msk.f32.vlgmr.msra.gmra.mrb[14].mxu0 %vm1970_vm8, %v1969_v46 }
 0xc8a   :  { %4558 = vmatprep.mubr.msk.f32.mxu0 %vm4930_vm2, %v4931_v2 }
 0xd5c   :  { %v2040_v48 = vpop.f32.mrb[14].mxu0 }
 0xd5d   :  { %v2044_v49 = vadd.f32 %v2040_v48, %v5250_v61  ;;  %v4534_v50 = vpop.f32.mrb[15].mxu0  ;;  %v2057_v61 = vld [vmem:[%s4131_s17 + $0x18] sm:$0xff]  ;;  %s4113_s17 = sld [smem:[%s5556_s0 + %s4969_s3]]  }
 0xd5e   :  { %v4760_v62 = vpack.c.bf16 %v2057_v61, %v2056_v60 }
 0xd5f   :  { %v5288_v51 = vadd.f32 %v4192_v47, %v2044_v49 }
 0xd60   :  { %4761 = vmatpush3.bf16.msra.mxu1 %v4760_v62 }
 0xd61   :  { %v2080_v52 = vsel %vm293_vm1, %v5288_v51, 0.0  ;;  %4546 = vmatprep.subr.mxu1 %v4931_v2 }
 0xd62   :  { %2081 = vadd.xlane.f32.xlu0 %v2080_v52 }
 0xdef   :  { %v2082_v53 = vpop.xlane.xlu0 %2081 }
 0xdf0   :  { %v2083_v54 = vmul.f32 0.03125, %v2082_v53 }
 0xdf2   :  { %v2084_v55 = vsub.f32 %v5288_v51, %v2083_v54 }
 0xdf4   :  { %v2085_v56 = vmul.f32 %v2084_v55, %v2084_v55 }
 0xdf6   :  { %v2086_v36 = vsel %vm293_vm1, %v2085_v56, 0.0 }
 0xdf7   :  { %2087 = vadd.xlane.f32.xlu1 %v2086_v36 }
 0xe84   :  { %v2088_v63 = vpop.xlane.xlu1 %2087 }
 0xe85   :  { %v2089_v0 = vmul.f32 0.03125, %v2088_v63 }
 0xe87   :  { %v2090_v3 = vadd.f32 1e-05, %v2089_v0 }
 0xe89   :  { %4885 = vrsqrt.f32 %v2090_v3 }
 0xe93   :  { %v4886_v4 = vpop.eup %4885 }
 0xe94   :  { %v2092_v58 = vmul.f32 %v4886_v4, %v2084_v55 }
 0xe96   :  { %v2099_v8 = vmul.f32 %v4193_v5, %v2092_v58 }
 0xe98   :  { %v2106_v9 = vadd.f32 %v4194_v6, %v2099_v8 }
 0xe9a   :  { %4544 = vmatmul.mubr.msk.f32.vlgmr.msra.gmra.mrb[26].mxu1 %vm293_vm1, %v2106_v9 }
 0xe9b   :  { %4548 = vmatprep.mubr.msk.f32.mxu1 %vm4930_vm2, %v4931_v2 }
 0xf6d   :  { %v2182_v11 = vpop.f32.mrb[26].mxu1 }
 0xf6e   :  { %v2183_v12 = vadd.f32 %v4195_v10, %v2182_v11  ;;  %v4545_v13 = vpop.f32.mrb[27].mxu1 }
 0xf70   :  { %2354 = vrot.lane.b32.xlu1 %v2183_v12, %s4937_s6  ;;  %2187 = vrot.lane.b32.xlu0 %v2183_v12, %s4936_s5  ;;  %v5317_v14 = vrot.slane %v2183_v12, 4 }
 0xf74   :  { %2352 = vrot.lane.b32.xlu1 %v2183_v12, %s4938_s7  ;;  %2521 = vrot.lane.b32.xlu0 %v2183_v12, %s4940_s9 }
 0xf78   :  { %2519 = vrot.lane.b32.xlu1 %v2183_v12, %s4941_s10  ;;  %2688 = vrot.lane.b32.xlu0 %v2183_v12, %s4942_s11 }
 0xf7c   :  { %2686 = vrot.lane.b32.xlu1 %v2183_v12, %s4943_s12  ;;  %2869 = vrot.lane.b32.xlu0 %v5317_v14, %s4936_s5  ;;  %s4966_s5 = smov 29  }
 0xf80   :  { %3036 = vrot.lane.b32.xlu1 %v5317_v14, %s4937_s6  ;;  %3034 = vrot.lane.b32.xlu0 %v5317_v14, %s4938_s7  ;;  %s4147_s6 = sld [smem:[%s5556_s0 + %s4973_s2]]  }
 0xf84   :  { %3203 = vrot.lane.b32.xlu1 %v5317_v14, %s4940_s9  ;;  %3201 = vrot.lane.b32.xlu0 %v5317_v14, %s4941_s10 }
 0xf88   :  { %3370 = vrot.lane.b32.xlu1 %v5317_v14, %s4942_s11  ;;  %3368 = vrot.lane.b32.xlu0 %v5317_v14, %s4943_s12  ;;  %s4961_s11 = smov 25   ;;  %s4968_s12 = smov 31  }
 0xf8c   :  { %2273 = vrot.lane.b32.xlu1 %v2183_v12, %s4935_s4  ;;  %2440 = vrot.lane.b32.xlu0 %v2183_v12, %s4939_s8 }
 0xf90   :  { %2607 = vrot.lane.b32.xlu1 %v2183_v12, %s4945_s14 }
 0xf94   :  { %2774 = vrot.lane.b32.xlu1 %v2183_v12, %s4944_s13 }
 0xfe2   :  { %v2355_v7 = vpop.permute.xlu1 %2354  ;;  %v2188_v15 = vpop.permute.xlu0 %2187 }
 0xfe3   :  { %4547 = vmatpush3.xpose.msk.msra.mxu1 %vm404_vm3, %v2188_v15  ;;  %4557 = vmatpush3.xpose.msk.msra.mxu0 %vm404_vm3, %v2355_v7 }
 0xfe4   :  { %4566 = vmatprep.subr.mxu0 %v4931_v2  ;;  %4551 = vmatprep.subr.mxu1 %v4931_v2 }
 0xfe6   :  { %v2353_v16 = vpop.permute.xlu1 %2352  ;;  %4549 = vmatmul.mubr.msk.f32.vlgmr.msra.gmra.mrb[28].mxu1 %vm404_vm3, %v2183_v12  ;;  %v2522_v17 = vpop.permute.xlu0 %2521 }
 0xfe7   :  { %4559 = vmatmul.mubr.msk.f32.vlgmr.msra.gmra.mrb[16].mxu0 %vm404_vm3, %v2353_v16  ;;  %4553 = vmatprep.mubr.msk.f32.mxu1 %vm4930_vm2, %v4931_v2 }
 0xfe8   :  { %4567 = vmatpush3.xpose.msk.msra.mxu0 %vm404_vm3, %v2522_v17  ;;  %4568 = vmatprep.mubr.msk.f32.mxu0 %vm4930_vm2, %v4931_v2 }
 0xfe9   :  { %4576 = vmatprep.subr.mxu0 %v4931_v2 }
 0xfea   :  { %v2520_v18 = vpop.permute.xlu1 %2519  ;;  %v2689_v19 = vpop.permute.xlu0 %2688 }
 0xfeb   :  { %4569 = vmatmul.mubr.msk.f32.vlgmr.msra.gmra.mrb[18].mxu0 %vm404_vm3, %v2520_v18 }
 0xfec   :  { %4577 = vmatpush3.xpose.msk.msra.mxu0 %vm404_vm3, %v2689_v19  ;;  %4578 = vmatprep.mubr.msk.f32.mxu0 %vm4930_vm2, %v4931_v2 }
 0xfed   :  { %4586 = vmatprep.subr.mxu0 %v4931_v2 }
 0xfee   :  { %v2687_v21 = vpop.permute.xlu1 %2686  ;;  %v2870_v22 = vpop.permute.xlu0 %2869 }
 0xfef   :  { %4579 = vmatmul.mubr.msk.f32.vlgmr.msra.gmra.mrb[20].mxu0 %vm404_vm3, %v2687_v21 }
 0xff0   :  { %4587 = vmatpush3.xpose.msk.msra.mxu0 %vm404_vm3, %v2870_v22  ;;  %4588 = vmatprep.mubr.msk.f32.mxu0 %vm4930_vm2, %v4931_v2 }
 0xff1   :  { %4596 = vmatprep.subr.mxu0 %v4931_v2 }
 0xff2   :  { %v3037_v23 = vpop.permute.xlu1 %3036  ;;  %v3035_v24 = vpop.permute.xlu0 %3034 }
 0xff3   :  { %4589 = vmatmul.mubr.msk.f32.vlgmr.msra.gmra.mrb[22].mxu0 %vm404_vm3, %v5317_v14 }
 0xff4   :  { %4597 = vmatpush3.xpose.msk.msra.mxu0 %vm404_vm3, %v3037_v23  ;;  %4598 = vmatprep.mubr.msk.f32.mxu0 %vm4930_vm2, %v4931_v2 }
 0xff5   :  { %4606 = vmatprep.subr.mxu0 %v4931_v2 }
 0xff6   :  { %v3204_v25 = vpop.permute.xlu1 %3203  ;;  %v3202_v20 = vpop.permute.xlu0 %3201 }
 0xff7   :  { %4599 = vmatmul.mubr.msk.f32.vlgmr.msra.gmra.mrb[24].mxu0 %vm404_vm3, %v3035_v24 }
 0xff8   :  { %4607 = vmatpush3.xpose.msk.msra.mxu0 %vm404_vm3, %v3204_v25  ;;  %4608 = vmatprep.mubr.msk.f32.mxu0 %vm4930_vm2, %v4931_v2 }
 0xff9   :  { %4616 = vmatprep.subr.mxu0 %v4931_v2 }
 0xffa   :  { %v3371_v26 = vpop.permute.xlu1 %3370  ;;  %v3369_v27 = vpop.permute.xlu0 %3368 }
 0xffb   :  { %4609 = vmatmul.mubr.msk.f32.vlgmr.msra.gmra.mrb[26].mxu0 %vm404_vm3, %v3202_v20 }
 0xffc   :  { %4617 = vmatpush3.xpose.msk.msra.mxu0 %vm404_vm3, %v3371_v26  ;;  %4618 = vmatprep.mubr.msk.f32.mxu0 %vm4930_vm2, %v4931_v2 }
 0xffd   :  { %4762 = vmatprep.subr.bf16.mxu0 %v4928_v1 }
 0xffe   :  { %v2274_v29 = vpop.permute.xlu1 %2273  ;;  %v2441_v3 = vpop.permute.xlu0 %2440 }
 0xfff   :  { %4552 = vmatpush3.msk.msra.mxu1 %vm262_vm0, %v2274_v29  ;;  %4619 = vmatmul.mubr.msk.f32.vlgmr.msra.gmra.mrb[28].mxu0 %vm404_vm3, %v3369_v27 }
0x1000   :  { %4561 = vmatprep.subr.mxu1 %v4931_v2  ;;  %4634 = vmatprep.mubr.msk.f32.mxu0 %vm4930_vm2, %v4931_v2 }
0x1002   :  { %v2608_v63 = vpop.permute.xlu1 %2607 }
0x1006   :  { %v2775_v0 = vpop.permute.xlu1 %2774 }
0x10b9   :  { %v2259_v30 = vpop.f32.mrb[28].mxu1 }
0x10ba   :  { %v2263_v31 = vmul.f32 0.35355338, %v2259_v30  ;;  %v4550_v32 = vpop.f32.mrb[29].mxu1  ;;  %v2426_v33 = vpop.f32.mrb[16].mxu0 }
0x10bb   :  { %v2430_v34 = vmul.f32 0.35355338, %v2426_v33  ;;  %v4560_v35 = vpop.f32.mrb[17].mxu0 }
0x10bc   :  { %v2264_v28 = vsel %vm480_vm4, %v2263_v31, -inf }
0x10bd   :  { %2265 = vmax.xlane.f32.xlu1 %v2264_v28  ;;  %v2431_v37 = vsel %vm480_vm4, %v2430_v34, -inf }
0x10be   :  { %v2593_v38 = vpop.f32.mrb[18].mxu0  ;;  %2432 = vmax.xlane.f32.xlu0 %v2431_v37 }
0x10bf   :  { %v2597_v40 = vmul.f32 0.35355338, %v2593_v38  ;;  %v4570_v41 = vpop.f32.mrb[19].mxu0 }
0x10c1   :  { %v2598_v42 = vsel %vm480_vm4, %v2597_v40, -inf }
0x10c2   :  { %v2760_v43 = vpop.f32.mrb[20].mxu0  ;;  %2599 = vmax.xlane.f32.xlu0 %v2598_v42 }
0x10c3   :  { %v4580_v44 = vpop.f32.mrb[21].mxu0  ;;  %v2764_v56 = vmul.f32 0.35355338, %v2760_v43 }
0x10c5   :  { %v2765_v39 = vsel %vm480_vm4, %v2764_v56, -inf }
0x10c6   :  { %v2941_v45 = vpop.f32.mrb[22].mxu0 }
0x10c7   :  { %v5384_v46 = vmul.f32 0.35355338, %v2941_v45  ;;  %v4590_v47 = vpop.f32.mrb[23].mxu0 }
0x10c9   :  { %v2946_v48 = vsel %vm480_vm4, %v5384_v46, -inf }
0x10ca   :  { %2947 = vmax.xlane.f32.xlu0 %v2946_v48  ;;  %v3108_v49 = vpop.f32.mrb[24].mxu0 }
0x10cb   :  { %v4600_v50 = vpop.f32.mrb[25].mxu0  ;;  %v3112_v36 = vmul.f32 0.35355338, %v3108_v49 }
0x10cd   :  { %v3113_v57 = vsel %vm480_vm4, %v3112_v36, -inf }
0x10ce   :  { %v3275_v52 = vpop.f32.mrb[26].mxu0  ;;  %2955 = vrot.lane.b32.xlu1 %v5317_v14, %s4935_s4  ;;  %s4959_s4 = smov 21  }
0x10cf   :  { %v4610_v53 = vpop.f32.mrb[27].mxu0  ;;  %v3279_v59 = vmul.f32 0.35355338, %v3275_v52  ;;  %s4133_s7 = sld [smem:[%s5556_s0 + %s4959_s4]]  }
0x10d0   :  { %s4140_s4 = sld [smem:[%s5556_s0 + %s4965_s29]]  }
0x10d1   :  { %v3280_v61 = vsel %vm480_vm4, %v3279_v59, -inf }
0x10d2   :  { %v3442_v54 = vpop.f32.mrb[28].mxu0 }
0x10d3   :  { %v4620_v55 = vpop.f32.mrb[29].mxu0  ;;  %v5394_v60 = vmul.f32 0.35355338, %v3442_v54 }
0x10d5   :  { %v3447_v62 = vsel %vm480_vm4, %v5394_v60, -inf }
0x10e0   :  { %3122 = vrot.lane.b32.xlu0 %v5317_v14, %s4939_s8  ;;  %s4967_s8 = smov 30  }
0x10f2   :  { %2766 = vmax.xlane.f32.xlu1 %v2765_v39 }
0x10f6   :  { %3114 = vmax.xlane.f32.xlu1 %v3113_v57 }
0x10ff   :  { %3281 = vmax.xlane.f32.xlu0 %v3280_v61 }
0x1103   :  { %3448 = vmax.xlane.f32.xlu0 %v3447_v62 }
0x1107   :  { %3289 = vrot.lane.b32.xlu1 %v5317_v14, %s4945_s14  ;;  %s4137_s14 = sld [smem:[%s5556_s0 + %s4961_s11]]  }
0x1108   :  { %s4142_s11 = sld [smem:[%s5556_s0 + %s4967_s8]]  }
0x1119   :  { %3456 = vrot.lane.b32.xlu0 %v5317_v14, %s4944_s13 }
0x114a   :  { %v2266_v4 = vpop.xlane.xlu1 %2265 }
0x114b   :  { %v2267_v5 = vsub.f32 %v2263_v31, %v2266_v4  ;;  %v2433_v58 = vpop.xlane.xlu0 %2432  ;;  %v2060_v4 = vld [vmem:[%s4133_s7 + $0x8] sm:$0xff] }
0x114c   :  { %v2434_v6 = vsub.f32 %v2430_v34, %v2433_v58 }
0x114d   :  { %v2268_v8 = vmul.f32 1.442695, %v2267_v5 }
0x114e   :  { %v2435_v9 = vmul.f32 1.442695, %v2434_v6  ;;  %v2956_v16 = vpop.permute.xlu1 %2955 }
0x114f   :  { %4887 = vpow2.f32 %v2268_v8  ;;  %v2600_v10 = vpop.xlane.xlu0 %2599 }
0x1150   :  { %4889 = vpow2.f32 %v2435_v9  ;;  %v2601_v11 = vsub.f32 %v2597_v40, %v2600_v10  ;;  %v2061_v10 = vld [vmem:[%s4133_s7 + $0x10] sm:$0xff] }
0x1152   :  { %v2602_v12 = vmul.f32 1.442695, %v2601_v11  ;;  %v2062_v11 = vld [vmem:[%s4133_s7 + $0x18] sm:$0xff] }
0x1154   :  { %4891 = vpow2.f32 %v2602_v12 }
0x1157   :  { %v2948_v17 = vpop.xlane.xlu0 %2947 }
0x1158   :  { %v2949_v18 = vsub.f32 %v5384_v46, %v2948_v17 }
0x1159   :  { %v5403_v13 = vpop.eup %4887 }
0x115a   :  { %v4890_v7 = vpop.eup %4889  ;;  %4554 = vmatmul.mubr.msk.f32.vlgmr.msra.gmra.mrb[30].mxu1 %vm492_vm5, %v5403_v13  ;;  %v2950_v23 = vmul.f32 1.442695, %v2949_v18  ;;  %v2270_v48 = vsel %vm480_vm4, %v5403_v13, 0.0 }
0x115b   :  { %4562 = vmatpush3.msk.msra.mxu1 %vm262_vm0, %v2441_v3  ;;  %v2437_v14 = vsel %vm480_vm4, %v4890_v7, 0.0  ;;  %4563 = vmatprep.mubr.msk.f32.mxu1 %vm4930_vm2, %v4931_v2  ;;  %v3123_v26 = vpop.permute.xlu0 %3122  ;;  %v2059_v3 = vld [vmem:[%s4133_s7] sm:$0xff] }
0x115c   :  { %2438 = vadd.xlane.f32.xlu0 %v2437_v14  ;;  %4571 = vmatprep.subr.mxu1 %v4931_v2  ;;  %v4763_v58 = vpack.c.bf16 %v2060_v4, %v2059_v3 }
0x115e   :  { %4564 = vmatmul.mubr.msk.f32.vlgmr.msra.gmra.mrb[32].mxu1 %vm492_vm5, %v4890_v7  ;;  %v4892_v15 = vpop.eup %4891  ;;  %4764 = vmatpush3.bf16.msra.mxu0 %v4763_v58  ;;  %v4766_v7 = vpack.c.bf16 %v2062_v11, %v2061_v10  ;;  %v2071_v11 = vld [vmem:[%s4139_s25] sm:$0xff] }
0x115f   :  { %4572 = vmatpush3.msk.msra.mxu1 %vm262_vm0, %v2608_v63  ;;  %4573 = vmatprep.mubr.msk.f32.mxu1 %vm4930_vm2, %v4931_v2  ;;  %v2604_v44 = vsel %vm480_vm4, %v4892_v15, 0.0 }
0x1160   :  { %4581 = vmatprep.subr.mxu1 %v4931_v2  ;;  %4765 = vmatprep.subr.bf16.mxu0 %v4928_v1 }
0x1162   :  { %4574 = vmatmul.mubr.msk.f32.vlgmr.msra.gmra.mrb[34].mxu1 %vm492_vm5, %v4892_v15  ;;  %4767 = vmatpush3.bf16.msra.mxu0 %v4766_v7  ;;  %v2073_v7 = vld [vmem:[%s4139_s25 + $0x10] sm:$0xff] }
0x1163   :  { %4582 = vmatpush3.msk.msra.mxu1 %vm262_vm0, %v2775_v0  ;;  %4583 = vmatprep.mubr.msk.f32.mxu1 %vm4930_vm2, %v4931_v2 }
0x1164   :  { %4591 = vmatprep.subr.mxu1 %v4931_v2  ;;  %4774 = vmatprep.subr.bf16.mxu0 %v4928_v1 }
0x117f   :  { %v2767_v19 = vpop.xlane.xlu1 %2766 }
0x1180   :  { %v2768_v21 = vsub.f32 %v2764_v56, %v2767_v19 }
0x1182   :  { %v2769_v22 = vmul.f32 1.442695, %v2768_v21 }
0x1183   :  { %v3115_v24 = vpop.xlane.xlu1 %3114 }
0x1184   :  { %4893 = vpow2.f32 %v2769_v22  ;;  %v3116_v25 = vsub.f32 %v3112_v36, %v3115_v24 }
0x1185   :  { %4895 = vpow2.f32 %v2950_v23 }
0x1186   :  { %v3117_v20 = vmul.f32 1.442695, %v3116_v25 }
0x1187   :  { %v3290_v38 = vpop.permute.xlu1 %3289 }
0x1188   :  { %4897 = vpow2.f32 %v3117_v20 }
0x118c   :  { %v3282_v27 = vpop.xlane.xlu0 %3281 }
0x118d   :  { %v3283_v29 = vsub.f32 %v3279_v59, %v3282_v27 }
0x118e   :  { %v4894_v30 = vpop.eup %4893 }
0x118f   :  { %v3284_v31 = vmul.f32 1.442695, %v3283_v29  ;;  %4584 = vmatmul.mubr.msk.f32.vlgmr.msra.gmra.mrb[36].mxu1 %vm492_vm5, %v4894_v30  ;;  %v4896_v33 = vpop.eup %4895  ;;  %v2771_v47 = vsel %vm480_vm4, %v4894_v30, 0.0 }
0x1190   :  { %4592 = vmatpush3.msk.msra.mxu1 %vm262_vm0, %v2956_v16  ;;  %v3449_v32 = vpop.xlane.xlu0 %3448  ;;  %4593 = vmatprep.mubr.msk.f32.mxu1 %vm4930_vm2, %v4931_v2  ;;  %v2952_v46 = vsel %vm480_vm4, %v4896_v33, 0.0 }
0x1191   :  { %4899 = vpow2.f32 %v3284_v31  ;;  %v3450_v34 = vsub.f32 %v5394_v60, %v3449_v32  ;;  %4601 = vmatprep.subr.mxu1 %v4931_v2 }
0x1192   :  { %v4898_v35 = vpop.eup %4897 }
0x1193   :  { %v3451_v28 = vmul.f32 1.442695, %v3450_v34  ;;  %4594 = vmatmul.mubr.msk.f32.vlgmr.msra.gmra.mrb[38].mxu1 %vm492_vm5, %v4896_v33  ;;  %v3119_v37 = vsel %vm480_vm4, %v4898_v35, 0.0 }
0x1194   :  { %4602 = vmatpush3.msk.msra.mxu1 %vm262_vm0, %v3123_v26  ;;  %3120 = vadd.xlane.f32.xlu1 %v3119_v37  ;;  %v3457_v41 = vpop.permute.xlu0 %3456 }
0x1195   :  { %4901 = vpow2.f32 %v3451_v28  ;;  %4603 = vmatprep.mubr.msk.f32.mxu1 %vm4930_vm2, %v4931_v2  ;;  %4611 = vmatprep.subr.mxu1 %v4931_v2 }
0x1197   :  { %4604 = vmatmul.mubr.msk.f32.vlgmr.msra.gmra.mrb[40].mxu1 %vm492_vm5, %v4898_v35 }
0x1198   :  { %4612 = vmatpush3.msk.msra.mxu1 %vm262_vm0, %v3290_v38  ;;  %4613 = vmatprep.mubr.msk.f32.mxu1 %vm4930_vm2, %v4931_v2 }
0x1199   :  { %4621 = vmatprep.subr.mxu1 %v4931_v2 }
0x119b   :  { %v4900_v40 = vpop.eup %4899 }
0x119c   :  { %4614 = vmatmul.mubr.msk.f32.vlgmr.msra.gmra.mrb[42].mxu1 %vm492_vm5, %v4900_v40  ;;  %v3286_v42 = vsel %vm480_vm4, %v4900_v40, 0.0 }
0x119d   :  { %4622 = vmatpush3.msk.msra.mxu1 %vm262_vm0, %v3457_v41  ;;  %3287 = vadd.xlane.f32.xlu0 %v3286_v42 }
0x119e   :  { %4623 = vmatprep.mubr.msk.f32.mxu1 %vm4930_vm2, %v4931_v2  ;;  %4768 = vmatprep.subr.bf16.mxu1 %v4928_v1 }
0x119f   :  { %v4902_v43 = vpop.eup %4901 }
0x11a0   :  { %4624 = vmatmul.mubr.msk.f32.vlgmr.msra.gmra.mrb[44].mxu1 %vm492_vm5, %v4902_v43  ;;  %v3453_v45 = vsel %vm480_vm4, %v4902_v43, 0.0 }
0x11a1   :  { %2605 = vadd.xlane.f32.xlu0 %v2604_v44  ;;  %3454 = vadd.xlane.f32.xlu1 %v3453_v45 }
0x11a2   :  { %4645 = vmatprep.mubr.msk.f32.mxu1 %vm4930_vm2, %v4931_v2 }
0x11a5   :  { %2953 = vadd.xlane.f32.xlu0 %v2952_v46  ;;  %2772 = vadd.xlane.f32.xlu1 %v2771_v47 }
0x11a9   :  { %2271 = vadd.xlane.f32.xlu1 %v2270_v48 }
0x11e9   :  { %v2439_v49 = vpop.xlane.xlu0 %2438 }
0x11ea   :  { %4903 = vrcp.f32 %v2439_v49 }
0x11f4   :  { %v4904_v53 = vpop.eup %4903 }
0x1221   :  { %v3121_v57 = vpop.xlane.xlu1 %3120 }
0x1222   :  { %4905 = vrcp.f32 %v3121_v57 }
0x122a   :  { %v3288_v59 = vpop.xlane.xlu0 %3287 }
0x122b   :  { %4907 = vrcp.f32 %v3288_v59  ;;  %v2067_v59 = vld [vmem:[%s4137_s14 + $0x8] sm:$0xff] }
0x122c   :  { %v4906_v6 = vpop.eup %4905 }
0x122d   :  { %v5455_v50 = vpop.f32.mrb[30].mxu1 }
0x122e   :  { %v4555_v52 = vpop.f32.mrb[31].mxu1  ;;  %v2606_v62 = vpop.xlane.xlu0 %2605 }
0x122f   :  { %v3455_v63 = vpop.xlane.xlu1 %3454  ;;  %4909 = vrcp.f32 %v2606_v62  ;;  %v2069_v62 = vld [vmem:[%s4137_s14 + $0x18] sm:$0xff] }
0x1230   :  { %4911 = vrcp.f32 %v3455_v63 }
0x1231   :  { %v2513_v54 = vpop.f32.mrb[32].mxu1 }
0x1232   :  { %v2518_v55 = vmul.f32 %v4904_v53, %v2513_v54  ;;  %v4565_v56 = vpop.f32.mrb[33].mxu1  ;;  %v2954_v26 = vpop.xlane.xlu0 %2953 }
0x1233   :  { %v2773_v8 = vpop.xlane.xlu1 %2772 }
0x1234   :  { %2854 = vrot.lane.b32.xlu1 %v2518_v55, %s4934_s30  ;;  %4913 = vrcp.f32 %v2773_v8  ;;  %v4232_v8 = vld [vmem:[%s4136_s21] ss:$0 sm:$0xff] }
0x1235   :  { %v2680_v36 = vpop.f32.mrb[34].mxu1  ;;  %v4908_v14 = vpop.eup %4907  ;;  %4915 = vrcp.f32 %v2954_v26 }
0x1236   :  { %v4575_v39 = vpop.f32.mrb[35].mxu1 }
0x1237   :  { %v2272_v27 = vpop.xlane.xlu1 %2271 }
0x1238   :  { %4917 = vrcp.f32 %v2272_v27 }
0x1239   :  { %v4910_v18 = vpop.eup %4909 }
0x123a   :  { %v4912_v19 = vpop.eup %4911  ;;  %v2685_v22 = vmul.f32 %v4910_v18, %v2680_v36 }
0x123e   :  { %v4914_v25 = vpop.eup %4913 }
0x123f   :  { %v4916_v30 = vpop.eup %4915 }
0x1242   :  { %v4918_v34 = vpop.eup %4917 }
0x1243   :  { %v2351_v38 = vmul.f32 %v4918_v34, %v5455_v50 }
0x1262   :  { %v2847_v60 = vpop.f32.mrb[36].mxu1 }
0x1263   :  { %v4585_v61 = vpop.f32.mrb[37].mxu1  ;;  %v2852_v20 = vmul.f32 %v4914_v25, %v2847_v60 }
0x1264   :  { %v2068_v61 = vld [vmem:[%s4137_s14 + $0x10] sm:$0xff] }
0x1265   :  { %v4772_v63 = vpack.c.bf16 %v2069_v62, %v2068_v61 }
0x1266   :  { %v3028_v0 = vpop.f32.mrb[38].mxu1 }
0x1267   :  { %v4595_v5 = vpop.f32.mrb[39].mxu1  ;;  %v3033_v33 = vmul.f32 %v4916_v30, %v3028_v0 }
0x126a   :  { %v3195_v9 = vpop.f32.mrb[40].mxu1 }
0x126b   :  { %v3200_v12 = vmul.f32 %v4906_v6, %v3195_v9  ;;  %v4605_v13 = vpop.f32.mrb[41].mxu1 }
0x126d   :  { %3536 = vrot.lane.b32.xlu0 %v3200_v12, %s4934_s30  ;;  %s4960_s30 = smov 22   ;;  %v2072_v12 = vld [vmem:[%s4139_s25 + $0x8] sm:$0xff] }
0x126e   :  { %s4134_s10 = sld [smem:[%s5556_s0 + %s4960_s30]]   ;;  %v4775_v13 = vpack.c.bf16 %v2072_v12, %v2071_v11 }
0x126f   :  { %v3362_v15 = vpop.f32.mrb[42].mxu1  ;;  %s4141_s30 = sld [smem:[%s5556_s0 + %s4966_s5]]  }
0x1270   :  { %v3367_v16 = vmul.f32 %v4908_v14, %v3362_v15  ;;  %v4615_v17 = vpop.f32.mrb[43].mxu1  ;;  %v2074_v14 = vld [vmem:[%s4139_s25 + $0x18] sm:$0xff] }
0x1271   :  { %v4778_v15 = vpack.c.bf16 %v2074_v14, %v2073_v7  ;;  %v2076_v17 = vld [vmem:[%s4139_s25 + $0x28] sm:$0xff] }
0x1272   :  { %3540 = vrot.lane.b32.xlu1 %v3367_v16, %s4947_s19  ;;  %v2075_v16 = vld [vmem:[%s4139_s25 + $0x20] sm:$0xff] }
0x1273   :  { %v3529_v21 = vpop.f32.mrb[44].mxu1  ;;  %v4781_v18 = vpack.c.bf16 %v2076_v17, %v2075_v16 }
0x1274   :  { %v3534_v23 = vmul.f32 %v4912_v19, %v3529_v21  ;;  %v4625_v24 = vpop.f32.mrb[45].mxu1  ;;  %v4230_v48 = vld [vmem:[%s4134_s10] ss:$0 sm:$0xff]  ;;  %v2077_v19 = vld [vmem:[%s4139_s25 + $0x30] sm:$0xff]  ;;  %v2078_v21 = vld [vmem:[%s4139_s25 + $0x38] sm:$0xff] }
0x1276   :  { %2858 = vrot.lane.b32.xlu1 %v2685_v22, %s4947_s19  ;;  %3544 = vrot.lane.b32.xlu0 %v3534_v23, %s4948_s20  ;;  %s4962_s19 = smov 23   ;;  %v4784_v22 = vpack.c.bf16 %v2078_v21, %v2077_v19 }
0x1277   :  { %s4135_s16 = sld [smem:[%s5556_s0 + %s4962_s19]]  }
0x1278   :  { %s4143_s19 = sld [smem:[%s5556_s0 + %s4968_s12]]  }
0x127a   :  { %2862 = vrot.lane.b32.xlu0 %v2852_v20, %s4948_s20  ;;  %s4964_s20 = smov 26  }
0x127b   :  { %s4138_s28 = sld [smem:[%s5556_s0 + %s4964_s20]]  }
0x127d   :  { %v4231_v58 = vld [vmem:[%s4135_s16] ss:$0 sm:$0xff] }
0x127e   :  { %v3836_v61 = vld [vmem:[%s4143_s19 + $0x18] sm:$0xff] }
0x1281   :  { %v4233_v23 = vld [vmem:[%s4138_s28] ss:$0 sm:$0xff] }
0x12a6   :  { %v2855_v29 = vpop.permute.xlu1 %2854 }
0x12a7   :  { %v2865_v42 = vsel %vm404_vm3, %v2351_v38, %v2855_v29 }
0x12df   :  { %v3537_v31 = vpop.permute.xlu0 %3536 }
0x12e0   :  { %v3547_v35 = vsel %vm404_vm3, %v3033_v33, %v3537_v31 }
0x12e4   :  { %v3541_v32 = vpop.permute.xlu1 %3540 }
0x12e5   :  { %v3548_v28 = vsel %vm1084_vm6, %v3547_v35, %v3541_v32 }
0x12e8   :  { %v3545_v37 = vpop.permute.xlu0 %3544  ;;  %v2859_v40 = vpop.permute.xlu1 %2858 }
0x12e9   :  { %v3549_v41 = vsel %vm1086_vm7, %v3548_v28, %v3545_v37  ;;  %v2866_v43 = vsel %vm1084_vm6, %v2865_v42, %v2859_v40  ;;  %v4236_v37 = vld [vmem:[%s4140_s4] ss:$0 sm:$0xff] }
0x12ea   :  { %v3551_v44 = vrot.slane %v3549_v41, 4 }
0x12ec   :  { %v2863_v45 = vpop.permute.xlu0 %2862 }
0x12ed   :  { %v2867_v46 = vsel %vm1086_vm7, %v2866_v43, %v2863_v45 }
0x12ee   :  { %v3553_v47 = vsel %vm262_vm0, %v2867_v46, %v3551_v44 }
0x12ef   :  { %4635 = vmatmul.mubr.msk.f32.vlgmr.msra.gmra.mrb[30].mxu0 %vm293_vm1, %v3553_v47 }
0x12f0   :  { %4664 = vmatprep.mubr.msk.f32.mxu0 %vm4930_vm2, %v4931_v2  ;;  %4776 = vmatpush3.bf16.msra.mxu0 %v4775_v13 }
0x12f1   :  { %4777 = vmatprep.subr.bf16.mxu0 %v4928_v1 }
0x12f4   :  { %4779 = vmatpush3.bf16.msra.mxu0 %v4778_v15 }
0x12f5   :  { %4780 = vmatprep.subr.bf16.mxu0 %v4928_v1 }
0x12f8   :  { %4782 = vmatpush3.bf16.msra.mxu0 %v4781_v18 }
0x12f9   :  { %4783 = vmatprep.subr.bf16.mxu0 %v4928_v1 }
0x12fc   :  { %4785 = vmatpush3.bf16.msra.mxu0 %v4784_v22 }
0x13c2   :  { %v3623_v49 = vpop.f32.mrb[30].mxu0 }
0x13c3   :  { %v3627_v50 = vadd.f32 %v3623_v49, %v5288_v51  ;;  %v4636_v52 = vpop.f32.mrb[31].mxu0  ;;  %v2066_v51 = vld [vmem:[%s4137_s14] sm:$0xff] }
0x13c4   :  { %v4769_v60 = vpack.c.bf16 %v2067_v59, %v2066_v51  ;;  %v148_v51 = vld [vmem:[%s4113_s17] sm:$0x3] }
0x13c5   :  { %v5483_v53 = vadd.f32 %v4230_v48, %v3627_v50 }
0x13c6   :  { %4770 = vmatpush3.bf16.msra.mxu1 %v4769_v60  ;;  %v3835_v60 = vld [vmem:[%s4143_s19 + $0x10] sm:$0xff] }
0x13c7   :  { %v3635_v54 = vsel %vm293_vm1, %v5483_v53, 0.0  ;;  %4771 = vmatprep.subr.bf16.mxu1 %v4928_v1  ;;  %v4790_v62 = vpack.c.bf16 %v3836_v61, %v3835_v60 }
0x13c8   :  { %3636 = vadd.xlane.f32.xlu1 %v3635_v54 }
0x13ca   :  { %4773 = vmatpush3.bf16.msra.mxu1 %v4772_v63  ;;  %v3838_v63 = vld [vmem:[%s4145_s23] sm:$0xff] }
0x13cb   :  { %4667 = vmatprep.subr.mxu1 %v4931_v2 }
0x1455   :  { %v3637_v55 = vpop.xlane.xlu1 %3636 }
0x1456   :  { %v3638_v56 = vmul.f32 0.03125, %v3637_v55  ;;  %v4238_v55 = vld [vmem:[%s4142_s11] ss:$0 sm:$0xff] }
0x1458   :  { %v3639_v36 = vsub.f32 %v5483_v53, %v3638_v56  ;;  %v3833_v56 = vld [vmem:[%s4143_s19] sm:$0xff] }
0x145a   :  { %v3640_v39 = vmul.f32 %v3639_v36, %v3639_v36 }
0x145c   :  { %v3641_v57 = vsel %vm293_vm1, %v3640_v39, 0.0 }
0x145d   :  { %3642 = vadd.xlane.f32.xlu0 %v3641_v57 }
0x14ea   :  { %v3643_v0 = vpop.xlane.xlu0 %3642 }
0x14eb   :  { %v3644_v3 = vmul.f32 0.03125, %v3643_v0  ;;  %v3839_v0 = vld [vmem:[%s4145_s23 + $0x8] sm:$0xff] }
0x14ed   :  { %v3645_v4 = vadd.f32 1e-05, %v3644_v3  ;;  %v4793_v3 = vpack.c.bf16 %v3839_v0, %v3838_v63 }
0x14ef   :  { %4919 = vrsqrt.f32 %v3645_v4 }
0x14f9   :  { %v4920_v5 = vpop.eup %4919 }
0x14fa   :  { %v3647_v6 = vmul.f32 %v4920_v5, %v3639_v36  ;;  %v3834_v36 = vld [vmem:[%s4143_s19 + $0x8] sm:$0xff] }
0x14fb   :  { %v4787_v59 = vpack.c.bf16 %v3834_v36, %v3833_v56 }
0x14fc   :  { %v3654_v9 = vmul.f32 %v4231_v58, %v3647_v6  ;;  %v3840_v58 = vld [vmem:[%s4145_s23 + $0x10] sm:$0xff]  ;;  %v3841_v6 = vld [vmem:[%s4145_s23 + $0x18] sm:$0xff] }
0x14fe   :  { %v3661_v10 = vadd.f32 %v4232_v8, %v3654_v9  ;;  %v4796_v8 = vpack.c.bf16 %v3841_v6, %v3840_v58  ;;  %v4240_v9 = vld [vmem:[%s4144_s26] ss:$0 sm:$0xff] }
0x1500   :  { %4646 = vmatmul.mubr.msk.f32.vlgmr.msra.gmra.mrb[46].mxu1 %vm293_vm1, %v3661_v10 }
0x1501   :  { %4669 = vmatprep.mubr.msk.f32.mxu1 %vm4930_vm2, %v4931_v2 }
0x15d3   :  { %v3737_v24 = vpop.f32.mrb[46].mxu1 }
0x15d4   :  { %v3738_v25 = vadd.f32 %v4233_v23, %v3737_v24  ;;  %v4647_v20 = vpop.f32.mrb[47].mxu1 }
0x15d6   :  { %v3741_v26 = vmul.f32 %v3738_v25, %v3738_v25 }
0x15d8   :  { %v3742_v27 = vmul.f32 %v3741_v26, %v3738_v25 }
0x15da   :  { %v3743_v29 = vmul.f32 0.044715, %v3742_v27 }
0x15dc   :  { %v3744_v30 = vadd.f32 %v3743_v29, %v3738_v25 }
0x15de   :  { %v3745_v31 = vmul.f32 0.7978846, %v3744_v30 }
0x15e0   :  { %4921 = vtanh.f32 %v3745_v31 }
0x15ea   :  { %v4922_v32 = vpop.eup %4921 }
0x15eb   :  { %v3747_v33 = vadd.f32 1.0, %v4922_v32 }
0x15ed   :  { %v3748_v34 = vmul.f32 0.5, %v3747_v33 }
0x15ef   :  { %v3749_v35 = vmul.f32 %v3748_v34, %v3738_v25 }
0x15f1   :  { %4665 = vmatmul.mubr.msk.f32.vlgmr.msra.gmra.mrb[32].mxu0 %vm1970_vm8, %v3749_v35 }
0x16c4   :  { %v3819_v28 = vpop.f32.mrb[32].mxu0 }
0x16c5   :  { %v3823_v38 = vadd.f32 %v3819_v28, %v5483_v53  ;;  %v4666_v40 = vpop.f32.mrb[33].mxu0  ;;  %v4237_v53 = vld [vmem:[%s4141_s30] ss:$0 sm:$0xff] }
0x16c7   :  { %v3830_v41 = vadd.f32 %v4236_v37, %v3823_v38 }
0x16c9   :  { %v3843_v42 = vsel %vm293_vm1, %v3830_v41, 0.0 }
0x16ca   :  { %3844 = vadd.xlane.f32.xlu0 %v3843_v42 }
0x1757   :  { %v3845_v43 = vpop.xlane.xlu0 %3844 }
0x1758   :  { %v3846_v44 = vmul.f32 0.03125, %v3845_v43 }
0x175a   :  { %v3847_v45 = vsub.f32 %v3830_v41, %v3846_v44 }
0x175c   :  { %v3848_v46 = vmul.f32 %v3847_v45, %v3847_v45 }
0x175e   :  { %v3849_v47 = vsel %vm293_vm1, %v3848_v46, 0.0 }
0x175f   :  { %3850 = vadd.xlane.f32.xlu1 %v3849_v47 }
0x17ec   :  { %v3851_v48 = vpop.xlane.xlu1 %3850 }
0x17ed   :  { %v3852_v49 = vmul.f32 0.03125, %v3851_v48 }
0x17ef   :  { %v3853_v50 = vadd.f32 1e-05, %v3852_v49 }
0x17f1   :  { %4923 = vrsqrt.f32 %v3853_v50 }
0x17fb   :  { %v4924_v52 = vpop.eup %4923 }
0x17fc   :  { %v3855_v54 = vmul.f32 %v4924_v52, %v3847_v45 }
0x17fe   :  { %v3862_v39 = vmul.f32 %v4237_v53, %v3855_v54 }
0x1800   :  { %v3869_v57 = vadd.f32 %v4238_v55, %v3862_v39 }
0x1802   :  { %4668 = vmatpush3.msra.mxu1 %v3869_v57 }
0x1803   :  { %4670 = vmatmul.mubr.msk.f32.vlgmr.msra.gmra.mrb[48].mxu1 %vm404_vm3, %v148_v51  ;;  %4786 = vmatprep.subr.bf16.mxu1 %v4928_v1 }
0x1804   :  { %4788 = vmatpush3.bf16.msra.mxu1 %v4787_v59  ;;  %4680 = vmatprep.mubr.msk.f32.mxu1 %vm4930_vm2, %v4931_v2 }
0x1805   :  { %4789 = vmatprep.subr.bf16.mxu1 %v4928_v1 }
0x1808   :  { %4791 = vmatpush3.bf16.msra.mxu1 %v4790_v62 }
0x1809   :  { %4792 = vmatprep.subr.bf16.mxu1 %v4928_v1 }
0x18d6   :  { %v3939_v4 = vpop.f32.mrb[48].mxu1 }
0x18d7   :  { %4681 = vmatmul.mubr.msk.f32.vlgmr.msra.gmra.mrb[50].mxu1 %vm293_vm1, %v3939_v4  ;;  %v4671_v5 = vpop.f32.mrb[49].mxu1 }
0x18d8   :  { %4794 = vmatpush3.bf16.msra.mxu1 %v4793_v3  ;;  %4691 = vmatprep.mubr.msk.f32.mxu1 %vm4930_vm2, %v4931_v2 }
0x18d9   :  { %4795 = vmatprep.subr.bf16.mxu1 %v4928_v1  ;;  %v4242_v1 = vld [vmem:[%s4146_s1] ss:$0 sm:$0xff] }
0x18dc   :  { %4797 = vmatpush3.bf16.msra.mxu1 %v4796_v8 }
0x19aa   :  { %v4018_v10 = vpop.f32.mrb[50].mxu1 }
0x19ab   :  { %v4019_v11 = vadd.f32 %v4240_v9, %v4018_v10  ;;  %v4682_v12 = vpop.f32.mrb[51].mxu1 }
0x19ad   :  { %4692 = vmatmul.mubr.msk.f32.vlgmr.msra.gmra.mrb[52].mxu1 %vm293_vm1, %v4019_v11 }
0x1a80   :  { %v4097_v2 = vpop.f32.mrb[52].mxu1 }
0x1a81   :  { %v4098_v13 = vadd.f32 %v4242_v1, %v4097_v2  ;;  %v4693_v7 = vpop.f32.mrb[53].mxu1 }
0x1a83   :  { %4102 = vrot.lane.b32.xlu0 %v4098_v13, %s4971_s24 }
0x1af5   :  { %v4103_v14 = vpop.permute.xlu0 %4102 }
0x1af6   :  { %v4105_v15 = vsel %vm293_vm1, %v4019_v11, %v4103_v14 }
0x1af7   :  { %v4107_v16 = vsel %vm4106_vm9, %v4105_v15, 0.0 }
0x1af8   :  { %4108 = vst [vmem:[%s4147_s6] sm:$0x3] %v4107_v16 }

</bundles_post_ra>
